<compile_context>
chip_gen: v7x
topology: tpu7x:2x2x1
jax: 0.10.0
libtpu: 0.0.40
codegen_flags: <defaults>
</compile_context>

<pallas_src>
import math

import jax
import jax.numpy as jnp
from jax import lax
from jax.experimental import pallas as pl
from jax.experimental.pallas import tpu as pltpu

# ---------------- small, module-consistent config ----------------
IMAGE_SIZE = 16
PATCH_SIZE = 4
NUM_LAYERS = 2
NUM_HEADS = 4
HIDDEN_DIM = 32
MLP_DIM = 64
BATCH = 2

N_PATCH = IMAGE_SIZE // PATCH_SIZE
SEQ_LEN = N_PATCH * N_PATCH               # 16  (no class token in this module variant)
PATCH_FEAT = 3 * PATCH_SIZE * PATCH_SIZE  # 48
PATCH_PAD = 128                           # patches zero-padded to a dense 128-lane row
HEAD_DIM = HIDDEN_DIM // NUM_HEADS        # 8
LN_EPS = 1e-6                             # functools.partial(nn.LayerNorm, eps=1e-6)

# Samples folded into one grid step.  Keep = BATCH on v5e/v6e/v7x at this size (the whole
# kernel is a few us and overhead-bound; splitting across v7x's two TCs only pays once
# each core gets >= ~128 tokens).  When batch grows, raise BATCH_BLOCK until TOKENS is
# ~128-256; past that, replace the dense (TOKENS, NUM_HEADS*TOKENS) masked attention slab
# with a per-sample attention loop while keeping projections/MLP at full TOKENS.
BATCH_BLOCK = BATCH
TOKENS = BATCH_BLOCK * SEQ_LEN            # 32 rows of the fused activation slab
ATTN_COLS = NUM_HEADS * TOKENS            # 128: lane width of the block-diag score slab


# ---------------- packed-weight layout (static, known at trace time) ----------------
def _build_layout():
    entries = [
        ("w_patch", PATCH_PAD, HIDDEN_DIM),        # rows 48:128 are zero padding
        ("pos", TOKENS, HIDDEN_DIM),               # positional emb (tiled) + conv bias
        ("attn_bias", TOKENS, ATTN_COLS),          # cross-sample -1e30 mask, tiled per head
        ("bd_mask", ATTN_COLS, HIDDEN_DIM),        # 0/1 block-diagonal head mask / pooler
    ]
    for l in range(NUM_LAYERS):
        entries += [
            (f"w_qkv_{l}", HIDDEN_DIM, 3 * HIDDEN_DIM), (f"b_qkv_{l}", 1, 3 * HIDDEN_DIM),
            (f"wo_{l}", HIDDEN_DIM, HIDDEN_DIM), (f"bo_{l}", 1, HIDDEN_DIM),
            (f"w1_{l}", HIDDEN_DIM, MLP_DIM), (f"b1_{l}", 1, MLP_DIM),
            (f"w2_{l}", MLP_DIM, HIDDEN_DIM), (f"b2_{l}", 1, HIDDEN_DIM),
        ]
    entries += [("lnf_w", 1, HIDDEN_DIM), ("lnf_b", 1, HIDDEN_DIM)]

    layout, cur = {}, 0
    for name, r, c in entries:
        layout[name] = (cur, r, c)
        cur += -(-r // 8) * 8        # 8-row (sublane) aligned -> every slice is tile-aligned
    return layout, -(-cur // 8) * 8


PACK_LAYOUT, PACK_ROWS = _build_layout()
PACK_COLS = 128                      # lane-dense packed buffer
assert all(c <= PACK_COLS for (_, _, c) in PACK_LAYOUT.values())
assert ATTN_COLS <= PACK_COLS, "grow BATCH_BLOCK past this -> switch to per-sample attention loop"


# ---------------- math helpers ----------------
def _erf(x):
    # Eigen/XLA f32 rational approximation of erf (what f32 XLA erf uses).
    x = jnp.clip(x, -4.0, 4.0)
    x2 = x * x
    a = jnp.float32(-2.72614225801306e-10)
    for c in (2.77068142495902e-08, -2.10102402082508e-06, -5.69250639462346e-05,
              -7.34990630326855e-04, -2.95459980854025e-03, -1.60960333262415e-02):
        a = a * x2 + jnp.float32(c)
    b = jnp.float32(-1.45660718464996e-05)
    for c in (-2.13374055278905e-04, -1.68282697438203e-03,
              -7.37332916720468e-03, -1.42647390514189e-02):
        b = b * x2 + jnp.float32(c)
    # exact reciprocal instead of divide: lands on the (otherwise idle) EUP slot
    return x * a * pl.reciprocal(b)


def _gelu(x):
    # torch.nn.GELU default = exact (erf-based) GELU; kept exact for parity with torch.
    return 0.5 * x * (1.0 + _erf(x * jnp.float32(1.0 / math.sqrt(2.0))))


def _ln(x):
    # torch.nn.LayerNorm core (biased variance, eps inside rsqrt); affine is either folded
    # into the following matmul at pack time (ln_1 / ln_2) or applied at the call site (final ln).
    mean = jnp.mean(x, axis=-1, keepdims=True)
    xc = x - mean
    var = jnp.mean(xc * xc, axis=-1, keepdims=True)
    return xc * lax.rsqrt(var + jnp.float32(LN_EPS))


# ---------------- the fused kernel ----------------
def vit_kernel(patches_ref, w_ref, out_ref):
    D, NH = HIDDEN_DIM, NUM_HEADS

    def W(name, full_width=False):
        r0, nr, nc = PACK_LAYOUT[name]          # static Python ints -> free ref slices
        return w_ref[r0:r0 + nr, :] if full_width else w_ref[r0:r0 + nr, 0:nc]

    # conv_proj (Conv2d k=P, s=P on unfolded patches) == one dense (T,128)@(128,128) matmul;
    # pad lanes/rows are zero so cols D:128 of the result are exactly 0.
    x0 = jnp.dot(patches_ref[...], W("w_patch", True),
                 preferred_element_type=jnp.float32)
    # positional embedding (+ folded conv bias); dropout p=0 -> identity
    x = x0[:, 0:D] + W("pos")

    attn_bias = W("attn_bias", True)            # (T, NH*T): 0 same-sample, -1e30 otherwise
    bd_mask = W("bd_mask")                      # (NH*T, D): 1 where row-block h meets head-h cols

    for l in range(NUM_LAYERS):
        # ---------- multi-head self-attention (block-diagonal, lane-dense) ----------
        y = _ln(x)                              # ln_1 affine folded into w_qkv/b_qkv
        qkv = jnp.dot(y, W(f"w_qkv_{l}", True),
                      preferred_element_type=jnp.float32) + W(f"b_qkv_{l}", True)
        q = qkv[:, 0:D]                         # 1/sqrt(head_dim) folded in at pack time
        # Kbd/Vbd: replicate K (resp. V) once per head along sublanes, zero the cross-head
        # feature columns -> block-diagonal (NH*T, D) operands.
        kbd = jnp.concatenate([qkv[:, D:2 * D]] * NH, axis=0) * bd_mask
        vbd = jnp.concatenate([qkv[:, 2 * D:3 * D]] * NH, axis=0) * bd_mask
        # S[:, h*T:(h+1)*T] == Q_h @ K_h^T  (one MXU op for all heads, 128 dense lanes)
        s = lax.dot_general(q, kbd, (((1,), (1,)), ((), ())),
                            preferred_element_type=jnp.float32) + attn_bias
        # One softmax on the whole slab.  Row max over all heads cancels per head; the
        # per-head denominator is recovered by block-pooling with bd_mask.
        s = s - jnp.max(s, axis=-1, keepdims=True)
        p = jnp.exp(s)                                                     # (T, NH*T) dense
        denom = jnp.dot(p, bd_mask, preferred_element_type=jnp.float32)    # (T, D) per-head sums
        ctx = jnp.dot(p, vbd, preferred_element_type=jnp.float32) * pl.reciprocal(denom)
        # ctx columns are already in concat(heads) order -> single output projection
        attn = jnp.dot(ctx, W(f"wo_{l}", True), preferred_element_type=jnp.float32)
        x = x + attn[:, 0:D] + W(f"bo_{l}")                                # residual

        # ---------- MLP ----------
        y = _ln(x)                              # ln_2 affine folded into w1/b1
        hmid = jnp.dot(y, W(f"w1_{l}", True),
                       preferred_element_type=jnp.float32) + W(f"b1_{l}", True)
        hmid = _gelu(hmid)                      # pad lanes stay 0 (gelu(0) == 0)
        out2 = jnp.dot(hmid[:, 0:MLP_DIM], W(f"w2_{l}", True),
                       preferred_element_type=jnp.float32)
        x = x + out2[:, 0:D] + W(f"b2_{l}")                                # residual

    # Encoder final LayerNorm (no following matmul -> keep affine in-kernel)
    out_ref[...] = _ln(x) * W("lnf_w") + W("lnf_b")


# ---------------- parameters & packing ----------------
def init_params(key):
    """Deterministic synthetic parameters. Weight matrices are stored in `x @ W`
    orientation (i.e. transposed relative to torch's (out, in) Linear weights)."""
    keys = jax.random.split(key, 8)
    L, D, M, C, S = NUM_LAYERS, HIDDEN_DIM, MLP_DIM, PATCH_FEAT, SEQ_LEN

    def nrm(k, shape, std=0.02):
        return (std * jax.random.normal(k, shape)).astype(jnp.float32)

    return {
        # conv_proj weight (D, 3, P, P) flattened over (c, kh, kw) and transposed -> (C, D)
        "w_patch": nrm(keys[0], (C, D), std=math.sqrt(1.0 / C)),
        "b_patch": jnp.zeros((1, D), jnp.float32),
        "pos":     nrm(keys[1], (S, D), std=0.02),
        "ln1_w": jnp.ones((L, 1, D), jnp.float32),
        "ln1_b": jnp.zeros((L, 1, D), jnp.float32),
        "wq": nrm(keys[2], (L, D, D)),
        "wk": nrm(keys[3], (L, D, D)),
        "wv": nrm(keys[4], (L, D, D)),
        "bq": jnp.zeros((L, 1, D), jnp.float32),
        "bk": jnp.zeros((L, 1, D), jnp.float32),
        "bv": jnp.zeros((L, 1, D), jnp.float32),
        "wo": nrm(keys[5], (L, D, D)),
        "bo": jnp.zeros((L, 1, D), jnp.float32),
        "ln2_w": jnp.ones((L, 1, D), jnp.float32),
        "ln2_b": jnp.zeros((L, 1, D), jnp.float32),
        "w1": nrm(keys[6], (L, D, M)),
        "b1": jnp.zeros((L, 1, M), jnp.float32),
        "w2": nrm(keys[7], (L, M, D)),
        "b2": jnp.zeros((L, 1, D), jnp.float32),
        "lnf_w": jnp.ones((1, D), jnp.float32),
        "lnf_b": jnp.zeros((1, D), jnp.float32),
    }


def pack_params(params):
    """Pack all weights/biases (+ pos, masks) into one (PACK_ROWS, 128) buffer, with
    pack-time algebraic folding: LN affines into the following matmul, conv bias into pos,
    1/sqrt(head_dim) into the Q projection."""
    D, S, NH, T = HIDDEN_DIM, SEQ_LEN, NUM_HEADS, TOKENS
    scale = jnp.float32(1.0 / math.sqrt(HEAD_DIM))

    # cross-sample additive mask (0 same folded sample, -1e30 otherwise), tiled per head
    sample_id = jnp.arange(T, dtype=jnp.int32) // S
    base_mask = jnp.where(sample_id[:, None] == sample_id[None, :],
                          jnp.float32(0.0), jnp.float32(-1e30))
    attn_bias = jnp.tile(base_mask, (1, NH))                               # (T, NH*T)

    # block-diagonal head mask / per-head pooling matrix: (NH*T, D)
    row_head = jnp.arange(NH * T, dtype=jnp.int32) // T
    col_head = jnp.arange(D, dtype=jnp.int32) // HEAD_DIM
    bd_mask = (row_head[:, None] == col_head[None, :]).astype(jnp.float32)

    w_patch = jnp.zeros((PATCH_PAD, D), jnp.float32).at[:PATCH_FEAT].set(params["w_patch"])

    vals = {
        "w_patch": w_patch,
        "pos": jnp.tile(params["pos"], (BATCH_BLOCK, 1)) + params["b_patch"],  # conv bias folded
        "attn_bias": attn_bias,
        "bd_mask": bd_mask,
        "lnf_w": params["lnf_w"],
        "lnf_b": params["lnf_b"],
    }
    for l in range(NUM_LAYERS):
        g1 = params["ln1_w"][l].reshape(D)
        be1 = params["ln1_b"][l].reshape(1, D)
        w_qkv = jnp.concatenate(
            [params["wq"][l] * scale, params["wk"][l], params["wv"][l]], axis=-1)
        b_qkv = jnp.concatenate(
            [params["bq"][l] * scale, params["bk"][l], params["bv"][l]], axis=-1)
        vals[f"w_qkv_{l}"] = g1[:, None] * w_qkv          # ln_1 gamma folded into rows
        vals[f"b_qkv_{l}"] = be1 @ w_qkv + b_qkv          # ln_1 beta folded into bias
        vals[f"wo_{l}"] = params["wo"][l]
        vals[f"bo_{l}"] = params["bo"][l]
        g2 = params["ln2_w"][l].reshape(D)
        be2 = params["ln2_b"][l].reshape(1, D)
        vals[f"w1_{l}"] = g2[:, None] * params["w1"][l]   # ln_2 gamma folded
        vals[f"b1_{l}"] = be2 @ params["w1"][l] + params["b1"][l]
        vals[f"w2_{l}"] = params["w2"][l]
        vals[f"b2_{l}"] = params["b2"][l]

    packed = jnp.zeros((PACK_ROWS, PACK_COLS), jnp.float32)
    for name, arr in vals.items():
        r0, nr, nc = PACK_LAYOUT[name]
        packed = packed.at[r0:r0 + nr, 0:nc].set(
            jnp.asarray(arr, jnp.float32).reshape(nr, nc))
    return packed


# ---------------- wrapper ----------------
def vit_forward(images, params):
    """images: (N, 3, IMAGE_SIZE, IMAGE_SIZE) float32 (NCHW, same as torch)."""
    N = images.shape[0]
    assert N % BATCH_BLOCK == 0

    # Unfold NCHW into (N*S, 3*P*P) patches; feature order (c, kh, kw) matches flattening
    # the Conv2d weight (D, 3, P, P) -> (D, 3*P*P).  Zero-pad to 128 lanes -> dense tiles.
    x = images.reshape(N, 3, N_PATCH, PATCH_SIZE, N_PATCH, PATCH_SIZE)
    x = x.transpose(0, 2, 4, 1, 3, 5).reshape(N * SEQ_LEN, PATCH_FEAT)
    x = jnp.pad(x, ((0, 0), (0, PATCH_PAD - PATCH_FEAT)))

    packed = pack_params(params)

    out = pl.pallas_call(
        vit_kernel,
        out_shape=jax.ShapeDtypeStruct((N * SEQ_LEN, HIDDEN_DIM), jnp.float32),
        grid_spec=pltpu.PrefetchScalarGridSpec(
            num_scalar_prefetch=0,
            grid=(N // BATCH_BLOCK,),
            in_specs=[
                pl.BlockSpec((TOKENS, PATCH_PAD), lambda i: (i, 0)),
                # one ~360 KB weight DMA (constant index_map). NOTE: default double
                # buffering of this constant block wastes one extra copy of it in VMEM;
                # negligible here (<1 MiB total) but single-buffer it if TOKENS / the
                # O(TOKENS^2) mask ever grow toward the scoped-VMEM limit.
                pl.BlockSpec((PACK_ROWS, PACK_COLS), lambda i: (0, 0)),
            ],
            out_specs=pl.BlockSpec((TOKENS, HIDDEN_DIM), lambda i: (i, 0)),
        ),
        compiler_params=pltpu.CompilerParams(
            dimension_semantics=("parallel",)),
    )(x, packed)

    return out.reshape(N, SEQ_LEN, HIDDEN_DIM)


if __name__ == "__main__":
    key = jax.random.PRNGKey(0)
    k_img, k_par = jax.random.split(key)
    images = jax.random.normal(k_img, (BATCH, 3, IMAGE_SIZE, IMAGE_SIZE), jnp.float32)
    params = init_params(k_par)

    out = vit_forward(images, params)
    out = jax.block_until_ready(out)

    assert out.shape == (BATCH, SEQ_LEN, HIDDEN_DIM), out.shape
    assert bool(jnp.all(jnp.isfinite(out)))
    print("KERNEL_OK")
</pallas_src>

<mosaic_0001>
module attributes {stable_mosaic.version = 11 : i64} {
  func.func @vit_kernel(%arg0: i32, %arg1: memref<32x128xf32, #tpu.memory_space<vmem>>, %arg2: memref<720x128xf32, #tpu.memory_space<vmem>>, %arg3: memref<32x32xf32, #tpu.memory_space<vmem>>) attributes {dimension_semantics = [#tpu.dimension_semantics<parallel>], iteration_bounds = array<i64: 1>, scalar_prefetch = 0 : i64, scratch_operands = 0 : i64, tpu.core_type = #tpu.core_type<tc>, window_params = [{transform_indices = @transform_0, window_bounds = array<i64: 32, 128>}, {pipeline_mode = #tpu.pipeline_mode<synchronous>, transform_indices = @transform_1, window_bounds = array<i64: 720, 128>}, {transform_indices = @transform_2, window_bounds = array<i64: 32, 32>}]} {
    %c0 = arith.constant 0 : index
    %c0_0 = arith.constant 0 : index
    %0 = vector.load %arg1[%c0, %c0_0] : memref<32x128xf32, #tpu.memory_space<vmem>>, vector<32x128xf32>
    %c0_1 = arith.constant 0 : index
    %c0_2 = arith.constant 0 : index
    %1 = vector.load %arg2[%c0_1, %c0_2] : memref<720x128xf32, #tpu.memory_space<vmem>>, vector<128x128xf32>
    %cst = arith.constant dense<0.000000e+00> : vector<32x128xf32>
    %2 = tpu.matmul %0, %1, %cst {dimension_numbers = #tpu.dot_dimension_numbers<[1], [0], [0], [1], [0, 0, 1, 1], [], []>} : vector<32x128xf32>, vector<128x128xf32>, vector<32x128xf32> -> vector<32x128xf32>
    %3 = vector.extract_strided_slice %2 {offsets = [0, 0], sizes = [32, 32], strides = [1, 1]} : vector<32x128xf32> to vector<32x32xf32>
    %c128 = arith.constant 128 : index
    %c0_3 = arith.constant 0 : index
    %4 = vector.load %arg2[%c128, %c0_3] : memref<720x128xf32, #tpu.memory_space<vmem>>, vector<32x32xf32>
    %5 = arith.addf %3, %4 : vector<32x32xf32>
    %c160 = arith.constant 160 : index
    %c0_4 = arith.constant 0 : index
    %6 = vector.load %arg2[%c160, %c0_4] : memref<720x128xf32, #tpu.memory_space<vmem>>, vector<32x128xf32>
    %c192 = arith.constant 192 : index
    %c0_5 = arith.constant 0 : index
    %7 = vector.load %arg2[%c192, %c0_5] : memref<720x128xf32, #tpu.memory_space<vmem>>, vector<128x32xf32>
    %cst_6 = arith.constant dense<0.000000e+00> : vector<32xf32>
    %8 = vector.multi_reduction <add>, %5, %cst_6 [1] : vector<32x32xf32> to vector<32xf32>
    %9 = vector.shape_cast %8 : vector<32xf32> to vector<32x1xf32>
    %cst_7 = arith.constant 3.200000e+01 : f32
    %10 = vector.broadcast %cst_7 : f32 to vector<32x1xf32>
    %11 = arith.divf %9, %10 : vector<32x1xf32>
    %12 = vector.broadcast %11 : vector<32x1xf32> to vector<32x32xf32>
    %13 = arith.subf %5, %12 : vector<32x32xf32>
    %14 = arith.mulf %13, %13 : vector<32x32xf32>
    %cst_8 = arith.constant dense<0.000000e+00> : vector<32xf32>
    %15 = vector.multi_reduction <add>, %14, %cst_8 [1] : vector<32x32xf32> to vector<32xf32>
    %16 = vector.shape_cast %15 : vector<32xf32> to vector<32x1xf32>
    %cst_9 = arith.constant 3.200000e+01 : f32
    %17 = vector.broadcast %cst_9 : f32 to vector<32x1xf32>
    %18 = arith.divf %16, %17 : vector<32x1xf32>
    %cst_10 = arith.constant 9.99999997E-7 : f32
    %19 = vector.broadcast %cst_10 : f32 to vector<32x1xf32>
    %20 = arith.addf %18, %19 : vector<32x1xf32>
    %21 = math.rsqrt %20 : vector<32x1xf32>
    %22 = vector.broadcast %21 : vector<32x1xf32> to vector<32x32xf32>
    %23 = arith.mulf %13, %22 : vector<32x32xf32>
    %c320 = arith.constant 320 : index
    %c0_11 = arith.constant 0 : index
    %24 = vector.load %arg2[%c320, %c0_11] : memref<720x128xf32, #tpu.memory_space<vmem>>, vector<32x128xf32>
    %cst_12 = arith.constant dense<0.000000e+00> : vector<32x128xf32>
    %25 = tpu.matmul %23, %24, %cst_12 {dimension_numbers = #tpu.dot_dimension_numbers<[1], [0], [0], [1], [0, 0, 1, 1], [], []>} : vector<32x32xf32>, vector<32x128xf32>, vector<32x128xf32> -> vector<32x128xf32>
    %c352 = arith.constant 352 : index
    %c0_13 = arith.constant 0 : index
    %26 = vector.load %arg2[%c352, %c0_13] : memref<720x128xf32, #tpu.memory_space<vmem>>, vector<1x128xf32>
    %27 = vector.broadcast %26 : vector<1x128xf32> to vector<32x128xf32>
    %28 = arith.addf %25, %27 : vector<32x128xf32>
    %29 = vector.extract_strided_slice %28 {offsets = [0, 0], sizes = [32, 32], strides = [1, 1]} : vector<32x128xf32> to vector<32x32xf32>
    %30 = vector.extract_strided_slice %28 {offsets = [0, 32], sizes = [32, 32], strides = [1, 1]} : vector<32x128xf32> to vector<32x32xf32>
    %31 = tpu.concatenate %30, %30, %30, %30 in 0 : vector<32x32xf32>, vector<32x32xf32>, vector<32x32xf32>, vector<32x32xf32> -> vector<128x32xf32>
    %32 = arith.mulf %31, %7 : vector<128x32xf32>
    %33 = vector.extract_strided_slice %28 {offsets = [0, 64], sizes = [32, 32], strides = [1, 1]} : vector<32x128xf32> to vector<32x32xf32>
    %34 = tpu.concatenate %33, %33, %33, %33 in 0 : vector<32x32xf32>, vector<32x32xf32>, vector<32x32xf32>, vector<32x32xf32> -> vector<128x32xf32>
    %35 = arith.mulf %34, %7 : vector<128x32xf32>
    %cst_14 = arith.constant dense<0.000000e+00> : vector<32x128xf32>
    %36 = tpu.matmul %29, %32, %cst_14 {dimension_numbers = #tpu.dot_dimension_numbers<[1], [1], [0], [0], [0, 0, 1, 0], [], []>} : vector<32x32xf32>, vector<128x32xf32>, vector<32x128xf32> -> vector<32x128xf32>
    %37 = arith.addf %36, %6 : vector<32x128xf32>
    %cst_15 = arith.constant dense<0xFF800000> : vector<32xf32>
    %38 = vector.multi_reduction <maximumf>, %37, %cst_15 [1] : vector<32x128xf32> to vector<32xf32>
    %39 = vector.shape_cast %38 : vector<32xf32> to vector<32x1xf32>
    %40 = vector.broadcast %39 : vector<32x1xf32> to vector<32x128xf32>
    %41 = arith.subf %37, %40 : vector<32x128xf32>
    %42 = math.exp %41 : vector<32x128xf32>
    %cst_16 = arith.constant dense<0.000000e+00> : vector<32x32xf32>
    %43 = tpu.matmul %42, %7, %cst_16 {dimension_numbers = #tpu.dot_dimension_numbers<[1], [0], [0], [1], [0, 0, 1, 1], [], []>} : vector<32x128xf32>, vector<128x32xf32>, vector<32x32xf32> -> vector<32x32xf32>
    %cst_17 = arith.constant dense<0.000000e+00> : vector<32x32xf32>
    %44 = tpu.matmul %42, %35, %cst_17 {dimension_numbers = #tpu.dot_dimension_numbers<[1], [0], [0], [1], [0, 0, 1, 1], [], []>} : vector<32x128xf32>, vector<128x32xf32>, vector<32x32xf32> -> vector<32x32xf32>
    %45 = tpu.reciprocal %43 : vector<32x32xf32> -> vector<32x32xf32>
    %46 = arith.mulf %44, %45 : vector<32x32xf32>
    %c360 = arith.constant 360 : index
    %c0_18 = arith.constant 0 : index
    %47 = vector.load %arg2[%c360, %c0_18] : memref<720x128xf32, #tpu.memory_space<vmem>>, vector<32x128xf32>
    %cst_19 = arith.constant dense<0.000000e+00> : vector<32x128xf32>
    %48 = tpu.matmul %46, %47, %cst_19 {dimension_numbers = #tpu.dot_dimension_numbers<[1], [0], [0], [1], [0, 0, 1, 1], [], []>} : vector<32x32xf32>, vector<32x128xf32>, vector<32x128xf32> -> vector<32x128xf32>
    %49 = vector.extract_strided_slice %48 {offsets = [0, 0], sizes = [32, 32], strides = [1, 1]} : vector<32x128xf32> to vector<32x32xf32>
    %50 = arith.addf %5, %49 : vector<32x32xf32>
    %c392 = arith.constant 392 : index
    %c0_20 = arith.constant 0 : index
    %51 = vector.load %arg2[%c392, %c0_20] : memref<720x128xf32, #tpu.memory_space<vmem>>, vector<1x32xf32>
    %52 = vector.broadcast %51 : vector<1x32xf32> to vector<32x32xf32>
    %53 = arith.addf %50, %52 : vector<32x32xf32>
    %cst_21 = arith.constant dense<0.000000e+00> : vector<32xf32>
    %54 = vector.multi_reduction <add>, %53, %cst_21 [1] : vector<32x32xf32> to vector<32xf32>
    %55 = vector.shape_cast %54 : vector<32xf32> to vector<32x1xf32>
    %cst_22 = arith.constant 3.200000e+01 : f32
    %56 = vector.broadcast %cst_22 : f32 to vector<32x1xf32>
    %57 = arith.divf %55, %56 : vector<32x1xf32>
    %58 = vector.broadcast %57 : vector<32x1xf32> to vector<32x32xf32>
    %59 = arith.subf %53, %58 : vector<32x32xf32>
    %60 = arith.mulf %59, %59 : vector<32x32xf32>
    %cst_23 = arith.constant dense<0.000000e+00> : vector<32xf32>
    %61 = vector.multi_reduction <add>, %60, %cst_23 [1] : vector<32x32xf32> to vector<32xf32>
    %62 = vector.shape_cast %61 : vector<32xf32> to vector<32x1xf32>
    %cst_24 = arith.constant 3.200000e+01 : f32
    %63 = vector.broadcast %cst_24 : f32 to vector<32x1xf32>
    %64 = arith.divf %62, %63 : vector<32x1xf32>
    %cst_25 = arith.constant 9.99999997E-7 : f32
    %65 = vector.broadcast %cst_25 : f32 to vector<32x1xf32>
    %66 = arith.addf %64, %65 : vector<32x1xf32>
    %67 = math.rsqrt %66 : vector<32x1xf32>
    %68 = vector.broadcast %67 : vector<32x1xf32> to vector<32x32xf32>
    %69 = arith.mulf %59, %68 : vector<32x32xf32>
    %c400 = arith.constant 400 : index
    %c0_26 = arith.constant 0 : index
    %70 = vector.load %arg2[%c400, %c0_26] : memref<720x128xf32, #tpu.memory_space<vmem>>, vector<32x128xf32>
    %cst_27 = arith.constant dense<0.000000e+00> : vector<32x128xf32>
    %71 = tpu.matmul %69, %70, %cst_27 {dimension_numbers = #tpu.dot_dimension_numbers<[1], [0], [0], [1], [0, 0, 1, 1], [], []>} : vector<32x32xf32>, vector<32x128xf32>, vector<32x128xf32> -> vector<32x128xf32>
    %c432 = arith.constant 432 : index
    %c0_28 = arith.constant 0 : index
    %72 = vector.load %arg2[%c432, %c0_28] : memref<720x128xf32, #tpu.memory_space<vmem>>, vector<1x128xf32>
    %73 = vector.broadcast %72 : vector<1x128xf32> to vector<32x128xf32>
    %74 = arith.addf %71, %73 : vector<32x128xf32>
    %cst_29 = arith.constant 5.000000e-01 : f32
    %75 = vector.broadcast %cst_29 : f32 to vector<32x128xf32>
    %76 = arith.mulf %75, %74 : vector<32x128xf32>
    %cst_30 = arith.constant 0.707106769 : f32
    %77 = vector.broadcast %cst_30 : f32 to vector<32x128xf32>
    %78 = arith.mulf %74, %77 : vector<32x128xf32>
    %cst_31 = arith.constant -4.000000e+00 : f32
    %cst_32 = arith.constant 4.000000e+00 : f32
    %79 = vector.broadcast %cst_31 : f32 to vector<32x128xf32>
    %80 = arith.maximumf %79, %78 : vector<32x128xf32>
    %81 = vector.broadcast %cst_32 : f32 to vector<32x128xf32>
    %82 = arith.minimumf %81, %80 : vector<32x128xf32>
    %83 = arith.mulf %82, %82 : vector<32x128xf32>
    %cst_33 = arith.constant -2.72614237E-10 : f32
    %84 = vector.broadcast %cst_33 : f32 to vector<32x128xf32>
    %85 = arith.mulf %84, %83 : vector<32x128xf32>
    %cst_34 = arith.constant 2.77068146E-8 : f32
    %86 = vector.broadcast %cst_34 : f32 to vector<32x128xf32>
    %87 = arith.addf %85, %86 : vector<32x128xf32>
    %88 = arith.mulf %87, %83 : vector<32x128xf32>
    %cst_35 = arith.constant -2.10102394E-6 : f32
    %89 = vector.broadcast %cst_35 : f32 to vector<32x128xf32>
    %90 = arith.addf %88, %89 : vector<32x128xf32>
    %91 = arith.mulf %90, %83 : vector<32x128xf32>
    %cst_36 = arith.constant -5.69250624E-5 : f32
    %92 = vector.broadcast %cst_36 : f32 to vector<32x128xf32>
    %93 = arith.addf %91, %92 : vector<32x128xf32>
    %94 = arith.mulf %93, %83 : vector<32x128xf32>
    %cst_37 = arith.constant -7.34990637E-4 : f32
    %95 = vector.broadcast %cst_37 : f32 to vector<32x128xf32>
    %96 = arith.addf %94, %95 : vector<32x128xf32>
    %97 = arith.mulf %96, %83 : vector<32x128xf32>
    %cst_38 = arith.constant -2.954600e-03 : f32
    %98 = vector.broadcast %cst_38 : f32 to vector<32x128xf32>
    %99 = arith.addf %97, %98 : vector<32x128xf32>
    %100 = arith.mulf %99, %83 : vector<32x128xf32>
    %cst_39 = arith.constant -0.0160960332 : f32
    %101 = vector.broadcast %cst_39 : f32 to vector<32x128xf32>
    %102 = arith.addf %100, %101 : vector<32x128xf32>
    %cst_40 = arith.constant -1.45660715E-5 : f32
    %103 = vector.broadcast %cst_40 : f32 to vector<32x128xf32>
    %104 = arith.mulf %103, %83 : vector<32x128xf32>
    %cst_41 = arith.constant -2.13374049E-4 : f32
    %105 = vector.broadcast %cst_41 : f32 to vector<32x128xf32>
    %106 = arith.addf %104, %105 : vector<32x128xf32>
    %107 = arith.mulf %106, %83 : vector<32x128xf32>
    %cst_42 = arith.constant -0.00168282702 : f32
    %108 = vector.broadcast %cst_42 : f32 to vector<32x128xf32>
    %109 = arith.addf %107, %108 : vector<32x128xf32>
    %110 = arith.mulf %109, %83 : vector<32x128xf32>
    %cst_43 = arith.constant -0.00737332925 : f32
    %111 = vector.broadcast %cst_43 : f32 to vector<32x128xf32>
    %112 = arith.addf %110, %111 : vector<32x128xf32>
    %113 = arith.mulf %112, %83 : vector<32x128xf32>
    %cst_44 = arith.constant -0.0142647391 : f32
    %114 = vector.broadcast %cst_44 : f32 to vector<32x128xf32>
    %115 = arith.addf %113, %114 : vector<32x128xf32>
    %116 = arith.mulf %82, %102 : vector<32x128xf32>
    %117 = tpu.reciprocal %115 : vector<32x128xf32> -> vector<32x128xf32>
    %118 = arith.mulf %116, %117 : vector<32x128xf32>
    %cst_45 = arith.constant 1.000000e+00 : f32
    %119 = vector.broadcast %cst_45 : f32 to vector<32x128xf32>
    %120 = arith.addf %119, %118 : vector<32x128xf32>
    %121 = arith.mulf %76, %120 : vector<32x128xf32>
    %122 = vector.extract_strided_slice %121 {offsets = [0, 0], sizes = [32, 64], strides = [1, 1]} : vector<32x128xf32> to vector<32x64xf32>
    %c440 = arith.constant 440 : index
    %c0_46 = arith.constant 0 : index
    %123 = vector.load %arg2[%c440, %c0_46] : memref<720x128xf32, #tpu.memory_space<vmem>>, vector<64x128xf32>
    %cst_47 = arith.constant dense<0.000000e+00> : vector<32x128xf32>
    %124 = tpu.matmul %122, %123, %cst_47 {dimension_numbers = #tpu.dot_dimension_numbers<[1], [0], [0], [1], [0, 0, 1, 1], [], []>} : vector<32x64xf32>, vector<64x128xf32>, vector<32x128xf32> -> vector<32x128xf32>
    %125 = vector.extract_strided_slice %124 {offsets = [0, 0], sizes = [32, 32], strides = [1, 1]} : vector<32x128xf32> to vector<32x32xf32>
    %126 = arith.addf %53, %125 : vector<32x32xf32>
    %c504 = arith.constant 504 : index
    %c0_48 = arith.constant 0 : index
    %127 = vector.load %arg2[%c504, %c0_48] : memref<720x128xf32, #tpu.memory_space<vmem>>, vector<1x32xf32>
    %128 = vector.broadcast %127 : vector<1x32xf32> to vector<32x32xf32>
    %129 = arith.addf %126, %128 : vector<32x32xf32>
    %cst_49 = arith.constant dense<0.000000e+00> : vector<32xf32>
    %130 = vector.multi_reduction <add>, %129, %cst_49 [1] : vector<32x32xf32> to vector<32xf32>
    %131 = vector.shape_cast %130 : vector<32xf32> to vector<32x1xf32>
    %cst_50 = arith.constant 3.200000e+01 : f32
    %132 = vector.broadcast %cst_50 : f32 to vector<32x1xf32>
    %133 = arith.divf %131, %132 : vector<32x1xf32>
    %134 = vector.broadcast %133 : vector<32x1xf32> to vector<32x32xf32>
    %135 = arith.subf %129, %134 : vector<32x32xf32>
    %136 = arith.mulf %135, %135 : vector<32x32xf32>
    %cst_51 = arith.constant dense<0.000000e+00> : vector<32xf32>
    %137 = vector.multi_reduction <add>, %136, %cst_51 [1] : vector<32x32xf32> to vector<32xf32>
    %138 = vector.shape_cast %137 : vector<32xf32> to vector<32x1xf32>
    %cst_52 = arith.constant 3.200000e+01 : f32
    %139 = vector.broadcast %cst_52 : f32 to vector<32x1xf32>
    %140 = arith.divf %138, %139 : vector<32x1xf32>
    %cst_53 = arith.constant 9.99999997E-7 : f32
    %141 = vector.broadcast %cst_53 : f32 to vector<32x1xf32>
    %142 = arith.addf %140, %141 : vector<32x1xf32>
    %143 = math.rsqrt %142 : vector<32x1xf32>
    %144 = vector.broadcast %143 : vector<32x1xf32> to vector<32x32xf32>
    %145 = arith.mulf %135, %144 : vector<32x32xf32>
    %c512 = arith.constant 512 : index
    %c0_54 = arith.constant 0 : index
    %146 = vector.load %arg2[%c512, %c0_54] : memref<720x128xf32, #tpu.memory_space<vmem>>, vector<32x128xf32>
    %cst_55 = arith.constant dense<0.000000e+00> : vector<32x128xf32>
    %147 = tpu.matmul %145, %146, %cst_55 {dimension_numbers = #tpu.dot_dimension_numbers<[1], [0], [0], [1], [0, 0, 1, 1], [], []>} : vector<32x32xf32>, vector<32x128xf32>, vector<32x128xf32> -> vector<32x128xf32>
    %c544 = arith.constant 544 : index
    %c0_56 = arith.constant 0 : index
    %148 = vector.load %arg2[%c544, %c0_56] : memref<720x128xf32, #tpu.memory_space<vmem>>, vector<1x128xf32>
    %149 = vector.broadcast %148 : vector<1x128xf32> to vector<32x128xf32>
    %150 = arith.addf %147, %149 : vector<32x128xf32>
    %151 = vector.extract_strided_slice %150 {offsets = [0, 0], sizes = [32, 32], strides = [1, 1]} : vector<32x128xf32> to vector<32x32xf32>
    %152 = vector.extract_strided_slice %150 {offsets = [0, 32], sizes = [32, 32], strides = [1, 1]} : vector<32x128xf32> to vector<32x32xf32>
    %153 = tpu.concatenate %152, %152, %152, %152 in 0 : vector<32x32xf32>, vector<32x32xf32>, vector<32x32xf32>, vector<32x32xf32> -> vector<128x32xf32>
    %154 = arith.mulf %153, %7 : vector<128x32xf32>
    %155 = vector.extract_strided_slice %150 {offsets = [0, 64], sizes = [32, 32], strides = [1, 1]} : vector<32x128xf32> to vector<32x32xf32>
    %156 = tpu.concatenate %155, %155, %155, %155 in 0 : vector<32x32xf32>, vector<32x32xf32>, vector<32x32xf32>, vector<32x32xf32> -> vector<128x32xf32>
    %157 = arith.mulf %156, %7 : vector<128x32xf32>
    %cst_57 = arith.constant dense<0.000000e+00> : vector<32x128xf32>
    %158 = tpu.matmul %151, %154, %cst_57 {dimension_numbers = #tpu.dot_dimension_numbers<[1], [1], [0], [0], [0, 0, 1, 0], [], []>} : vector<32x32xf32>, vector<128x32xf32>, vector<32x128xf32> -> vector<32x128xf32>
    %159 = arith.addf %158, %6 : vector<32x128xf32>
    %cst_58 = arith.constant dense<0xFF800000> : vector<32xf32>
    %160 = vector.multi_reduction <maximumf>, %159, %cst_58 [1] : vector<32x128xf32> to vector<32xf32>
    %161 = vector.shape_cast %160 : vector<32xf32> to vector<32x1xf32>
    %162 = vector.broadcast %161 : vector<32x1xf32> to vector<32x128xf32>
    %163 = arith.subf %159, %162 : vector<32x128xf32>
    %164 = math.exp %163 : vector<32x128xf32>
    %cst_59 = arith.constant dense<0.000000e+00> : vector<32x32xf32>
    %165 = tpu.matmul %164, %7, %cst_59 {dimension_numbers = #tpu.dot_dimension_numbers<[1], [0], [0], [1], [0, 0, 1, 1], [], []>} : vector<32x128xf32>, vector<128x32xf32>, vector<32x32xf32> -> vector<32x32xf32>
    %cst_60 = arith.constant dense<0.000000e+00> : vector<32x32xf32>
    %166 = tpu.matmul %164, %157, %cst_60 {dimension_numbers = #tpu.dot_dimension_numbers<[1], [0], [0], [1], [0, 0, 1, 1], [], []>} : vector<32x128xf32>, vector<128x32xf32>, vector<32x32xf32> -> vector<32x32xf32>
    %167 = tpu.reciprocal %165 : vector<32x32xf32> -> vector<32x32xf32>
    %168 = arith.mulf %166, %167 : vector<32x32xf32>
    %c552 = arith.constant 552 : index
    %c0_61 = arith.constant 0 : index
    %169 = vector.load %arg2[%c552, %c0_61] : memref<720x128xf32, #tpu.memory_space<vmem>>, vector<32x128xf32>
    %cst_62 = arith.constant dense<0.000000e+00> : vector<32x128xf32>
    %170 = tpu.matmul %168, %169, %cst_62 {dimension_numbers = #tpu.dot_dimension_numbers<[1], [0], [0], [1], [0, 0, 1, 1], [], []>} : vector<32x32xf32>, vector<32x128xf32>, vector<32x128xf32> -> vector<32x128xf32>
    %171 = vector.extract_strided_slice %170 {offsets = [0, 0], sizes = [32, 32], strides = [1, 1]} : vector<32x128xf32> to vector<32x32xf32>
    %172 = arith.addf %129, %171 : vector<32x32xf32>
    %c584 = arith.constant 584 : index
    %c0_63 = arith.constant 0 : index
    %173 = vector.load %arg2[%c584, %c0_63] : memref<720x128xf32, #tpu.memory_space<vmem>>, vector<1x32xf32>
    %174 = vector.broadcast %173 : vector<1x32xf32> to vector<32x32xf32>
    %175 = arith.addf %172, %174 : vector<32x32xf32>
    %cst_64 = arith.constant dense<0.000000e+00> : vector<32xf32>
    %176 = vector.multi_reduction <add>, %175, %cst_64 [1] : vector<32x32xf32> to vector<32xf32>
    %177 = vector.shape_cast %176 : vector<32xf32> to vector<32x1xf32>
    %cst_65 = arith.constant 3.200000e+01 : f32
    %178 = vector.broadcast %cst_65 : f32 to vector<32x1xf32>
    %179 = arith.divf %177, %178 : vector<32x1xf32>
    %180 = vector.broadcast %179 : vector<32x1xf32> to vector<32x32xf32>
    %181 = arith.subf %175, %180 : vector<32x32xf32>
    %182 = arith.mulf %181, %181 : vector<32x32xf32>
    %cst_66 = arith.constant dense<0.000000e+00> : vector<32xf32>
    %183 = vector.multi_reduction <add>, %182, %cst_66 [1] : vector<32x32xf32> to vector<32xf32>
    %184 = vector.shape_cast %183 : vector<32xf32> to vector<32x1xf32>
    %cst_67 = arith.constant 3.200000e+01 : f32
    %185 = vector.broadcast %cst_67 : f32 to vector<32x1xf32>
    %186 = arith.divf %184, %185 : vector<32x1xf32>
    %cst_68 = arith.constant 9.99999997E-7 : f32
    %187 = vector.broadcast %cst_68 : f32 to vector<32x1xf32>
    %188 = arith.addf %186, %187 : vector<32x1xf32>
    %189 = math.rsqrt %188 : vector<32x1xf32>
    %190 = vector.broadcast %189 : vector<32x1xf32> to vector<32x32xf32>
    %191 = arith.mulf %181, %190 : vector<32x32xf32>
    %c592 = arith.constant 592 : index
    %c0_69 = arith.constant 0 : index
    %192 = vector.load %arg2[%c592, %c0_69] : memref<720x128xf32, #tpu.memory_space<vmem>>, vector<32x128xf32>
    %cst_70 = arith.constant dense<0.000000e+00> : vector<32x128xf32>
    %193 = tpu.matmul %191, %192, %cst_70 {dimension_numbers = #tpu.dot_dimension_numbers<[1], [0], [0], [1], [0, 0, 1, 1], [], []>} : vector<32x32xf32>, vector<32x128xf32>, vector<32x128xf32> -> vector<32x128xf32>
    %c624 = arith.constant 624 : index
    %c0_71 = arith.constant 0 : index
    %194 = vector.load %arg2[%c624, %c0_71] : memref<720x128xf32, #tpu.memory_space<vmem>>, vector<1x128xf32>
    %195 = vector.broadcast %194 : vector<1x128xf32> to vector<32x128xf32>
    %196 = arith.addf %193, %195 : vector<32x128xf32>
    %cst_72 = arith.constant 5.000000e-01 : f32
    %197 = vector.broadcast %cst_72 : f32 to vector<32x128xf32>
    %198 = arith.mulf %197, %196 : vector<32x128xf32>
    %cst_73 = arith.constant 0.707106769 : f32
    %199 = vector.broadcast %cst_73 : f32 to vector<32x128xf32>
    %200 = arith.mulf %196, %199 : vector<32x128xf32>
    %cst_74 = arith.constant -4.000000e+00 : f32
    %cst_75 = arith.constant 4.000000e+00 : f32
    %201 = vector.broadcast %cst_74 : f32 to vector<32x128xf32>
    %202 = arith.maximumf %201, %200 : vector<32x128xf32>
    %203 = vector.broadcast %cst_75 : f32 to vector<32x128xf32>
    %204 = arith.minimumf %203, %202 : vector<32x128xf32>
    %205 = arith.mulf %204, %204 : vector<32x128xf32>
    %cst_76 = arith.constant -2.72614237E-10 : f32
    %206 = vector.broadcast %cst_76 : f32 to vector<32x128xf32>
    %207 = arith.mulf %206, %205 : vector<32x128xf32>
    %cst_77 = arith.constant 2.77068146E-8 : f32
    %208 = vector.broadcast %cst_77 : f32 to vector<32x128xf32>
    %209 = arith.addf %207, %208 : vector<32x128xf32>
    %210 = arith.mulf %209, %205 : vector<32x128xf32>
    %cst_78 = arith.constant -2.10102394E-6 : f32
    %211 = vector.broadcast %cst_78 : f32 to vector<32x128xf32>
    %212 = arith.addf %210, %211 : vector<32x128xf32>
    %213 = arith.mulf %212, %205 : vector<32x128xf32>
    %cst_79 = arith.constant -5.69250624E-5 : f32
    %214 = vector.broadcast %cst_79 : f32 to vector<32x128xf32>
    %215 = arith.addf %213, %214 : vector<32x128xf32>
    %216 = arith.mulf %215, %205 : vector<32x128xf32>
    %cst_80 = arith.constant -7.34990637E-4 : f32
    %217 = vector.broadcast %cst_80 : f32 to vector<32x128xf32>
    %218 = arith.addf %216, %217 : vector<32x128xf32>
    %219 = arith.mulf %218, %205 : vector<32x128xf32>
    %cst_81 = arith.constant -2.954600e-03 : f32
    %220 = vector.broadcast %cst_81 : f32 to vector<32x128xf32>
    %221 = arith.addf %219, %220 : vector<32x128xf32>
    %222 = arith.mulf %221, %205 : vector<32x128xf32>
    %cst_82 = arith.constant -0.0160960332 : f32
    %223 = vector.broadcast %cst_82 : f32 to vector<32x128xf32>
    %224 = arith.addf %222, %223 : vector<32x128xf32>
    %cst_83 = arith.constant -1.45660715E-5 : f32
    %225 = vector.broadcast %cst_83 : f32 to vector<32x128xf32>
    %226 = arith.mulf %225, %205 : vector<32x128xf32>
    %cst_84 = arith.constant -2.13374049E-4 : f32
    %227 = vector.broadcast %cst_84 : f32 to vector<32x128xf32>
    %228 = arith.addf %226, %227 : vector<32x128xf32>
    %229 = arith.mulf %228, %205 : vector<32x128xf32>
    %cst_85 = arith.constant -0.00168282702 : f32
    %230 = vector.broadcast %cst_85 : f32 to vector<32x128xf32>
    %231 = arith.addf %229, %230 : vector<32x128xf32>
    %232 = arith.mulf %231, %205 : vector<32x128xf32>
    %cst_86 = arith.constant -0.00737332925 : f32
    %233 = vector.broadcast %cst_86 : f32 to vector<32x128xf32>
    %234 = arith.addf %232, %233 : vector<32x128xf32>
    %235 = arith.mulf %234, %205 : vector<32x128xf32>
    %cst_87 = arith.constant -0.0142647391 : f32
    %236 = vector.broadcast %cst_87 : f32 to vector<32x128xf32>
    %237 = arith.addf %235, %236 : vector<32x128xf32>
    %238 = arith.mulf %204, %224 : vector<32x128xf32>
    %239 = tpu.reciprocal %237 : vector<32x128xf32> -> vector<32x128xf32>
    %240 = arith.mulf %238, %239 : vector<32x128xf32>
    %cst_88 = arith.constant 1.000000e+00 : f32
    %241 = vector.broadcast %cst_88 : f32 to vector<32x128xf32>
    %242 = arith.addf %241, %240 : vector<32x128xf32>
    %243 = arith.mulf %198, %242 : vector<32x128xf32>
    %244 = vector.extract_strided_slice %243 {offsets = [0, 0], sizes = [32, 64], strides = [1, 1]} : vector<32x128xf32> to vector<32x64xf32>
    %c632 = arith.constant 632 : index
    %c0_89 = arith.constant 0 : index
    %245 = vector.load %arg2[%c632, %c0_89] : memref<720x128xf32, #tpu.memory_space<vmem>>, vector<64x128xf32>
    %cst_90 = arith.constant dense<0.000000e+00> : vector<32x128xf32>
    %246 = tpu.matmul %244, %245, %cst_90 {dimension_numbers = #tpu.dot_dimension_numbers<[1], [0], [0], [1], [0, 0, 1, 1], [], []>} : vector<32x64xf32>, vector<64x128xf32>, vector<32x128xf32> -> vector<32x128xf32>
    %247 = vector.extract_strided_slice %246 {offsets = [0, 0], sizes = [32, 32], strides = [1, 1]} : vector<32x128xf32> to vector<32x32xf32>
    %248 = arith.addf %175, %247 : vector<32x32xf32>
    %c696 = arith.constant 696 : index
    %c0_91 = arith.constant 0 : index
    %249 = vector.load %arg2[%c696, %c0_91] : memref<720x128xf32, #tpu.memory_space<vmem>>, vector<1x32xf32>
    %250 = vector.broadcast %249 : vector<1x32xf32> to vector<32x32xf32>
    %251 = arith.addf %248, %250 : vector<32x32xf32>
    %cst_92 = arith.constant dense<0.000000e+00> : vector<32xf32>
    %252 = vector.multi_reduction <add>, %251, %cst_92 [1] : vector<32x32xf32> to vector<32xf32>
    %253 = vector.shape_cast %252 : vector<32xf32> to vector<32x1xf32>
    %cst_93 = arith.constant 3.200000e+01 : f32
    %254 = vector.broadcast %cst_93 : f32 to vector<32x1xf32>
    %255 = arith.divf %253, %254 : vector<32x1xf32>
    %256 = vector.broadcast %255 : vector<32x1xf32> to vector<32x32xf32>
    %257 = arith.subf %251, %256 : vector<32x32xf32>
    %258 = arith.mulf %257, %257 : vector<32x32xf32>
    %cst_94 = arith.constant dense<0.000000e+00> : vector<32xf32>
    %259 = vector.multi_reduction <add>, %258, %cst_94 [1] : vector<32x32xf32> to vector<32xf32>
    %260 = vector.shape_cast %259 : vector<32xf32> to vector<32x1xf32>
    %cst_95 = arith.constant 3.200000e+01 : f32
    %261 = vector.broadcast %cst_95 : f32 to vector<32x1xf32>
    %262 = arith.divf %260, %261 : vector<32x1xf32>
    %cst_96 = arith.constant 9.99999997E-7 : f32
    %263 = vector.broadcast %cst_96 : f32 to vector<32x1xf32>
    %264 = arith.addf %262, %263 : vector<32x1xf32>
    %265 = math.rsqrt %264 : vector<32x1xf32>
    %266 = vector.broadcast %265 : vector<32x1xf32> to vector<32x32xf32>
    %267 = arith.mulf %257, %266 : vector<32x32xf32>
    %c704 = arith.constant 704 : index
    %c0_97 = arith.constant 0 : index
    %268 = vector.load %arg2[%c704, %c0_97] : memref<720x128xf32, #tpu.memory_space<vmem>>, vector<1x32xf32>
    %269 = vector.broadcast %268 : vector<1x32xf32> to vector<32x32xf32>
    %270 = arith.mulf %267, %269 : vector<32x32xf32>
    %c712 = arith.constant 712 : index
    %c0_98 = arith.constant 0 : index
    %271 = vector.load %arg2[%c712, %c0_98] : memref<720x128xf32, #tpu.memory_space<vmem>>, vector<1x32xf32>
    %272 = vector.broadcast %271 : vector<1x32xf32> to vector<32x32xf32>
    %273 = arith.addf %270, %272 : vector<32x32xf32>
    %c0_99 = arith.constant 0 : index
    %c0_100 = arith.constant 0 : index
    %274 = vector.load %arg3[%c0_99, %c0_100] : memref<32x32xf32, #tpu.memory_space<vmem>>, vector<32x32xf32>
    tpu.vector_store %arg3[%c0_99, %c0_100], %273 {strides = array<i32>} : memref<32x32xf32, #tpu.memory_space<vmem>>, vector<32x32xf32>,
    return
  }
  func.func @transform_0(%arg0: i32) -> (i32, i32) {
    %c0_i32 = arith.constant 0 : i32
    %c0_i32_0 = arith.constant 0 : i32
    return %arg0, %c0_i32 : i32, i32
  }
  func.func @transform_1(%arg0: i32) -> (i32, i32) {
    %c0_i32 = arith.constant 0 : i32
    %c0_i32_0 = arith.constant 0 : i32
    %c0_i32_1 = arith.constant 0 : i32
    return %c0_i32, %c0_i32_0 : i32, i32
  }
  func.func @transform_2(%arg0: i32) -> (i32, i32) {
    %c0_i32 = arith.constant 0 : i32
    %c0_i32_0 = arith.constant 0 : i32
    return %arg0, %c0_i32 : i32, i32
  }
}

</mosaic_0001>

<bundles_post_ra>
// kernel: tpu_custom_call.1
= control target key start
LH: loop header
LB: loop body
LE: loop exit
PB: predicated region body
PF: predicated region fallthrough
CT: control target
= control target key end

     0   :  { %7 = vsyncpa [#allocation3], 0  ;;  %s4924_s0 = inlined_call_operand.hbm [shape: f32[32,128], index: 0, kind: input, shape index: {}]   ;;  %s4925_s1 = inlined_call_operand.hbm [shape: f32[720,128], index: 1, kind: input, shape index: {}]   ;;  %s4926_s2 = inlined_call_operand.hbm [shape: f32[32,32], index: 2, kind: output, shape index: {}]  }
   0x1   :  { %8 = vsyncpa [#allocation6], 0 }
   0x2   :  { %9 = vsyncpa [#allocation4], 0  ;;  %s4022_s9 = smov [#allocation2]   ;;  %s3950_s13 = scalar_lea.hbm %s4924_s0, 512 }
   0x3   :  { %s15_s10 = sshll.u32 %s4022_s9, 4  ;;  %p3951_p0 = scmp.ne.s32.totalorder %s4924_s0, %s3950_s13  ;;  %s16_s10 = int_to_ptr.vmem [resolvable:$true] %s15_s10 }
   0x4   :  { %p3954_p1 = scmp.lt.u32.totalorder %s3950_s13, %s4924_s0 }
   0x6   :  { %p3956_p2 = pnand %p3954_p1, %p3951_p0 }
   0x8   :  { %3959 = shalt.err (!%p3956_p2)
}
   0x9   :  { %s3960_s18 = scalar_lea.vmem %s16_s10, 512  ;;  %p3965_p4 = scmp.lt.s32.totalorder %s16_s10, %s16_s10 }
   0xa   :  { %p3961_p3 = scmp.ne.s32.totalorder %s16_s10, %s3960_s18  ;;  %p3966_p5 = scmp.lt.s32.totalorder %s3960_s18, %s3960_s18 }
   0xc   :  { %p3967_p6 = por %p3966_p5, %p3965_p4 }
   0xe   :  { %p3968_p7 = pnand %p3967_p6, %p3961_p3 }
  0x10   :  { %3971 = shalt.err (!%p3968_p7)
}
  0x11   :  { %s4023_s19 = smov 128   ;;  %s4024_s20 = smov 8  }
  0x12   :  { %21 = dma.hbm_to_vmem [thread:$0]  %s4924_s0, 512, %s16_s10, [#allocation3], %s4023_s19, %s4023_s19, %s4024_s20  }
  0x13   :  { %s4025_s23 = smov [#allocation5]   ;;  %s3972_s27 = scalar_lea.hbm %s4925_s1, 11520 }
  0x14   :  { %s27_s24 = sshll.u32 %s4025_s23, 4  ;;  %p3973_p8 = scmp.ne.s32.totalorder %s4925_s1, %s3972_s27  ;;  %s28_s24 = int_to_ptr.vmem [resolvable:$true] %s27_s24 }
  0x15   :  { %p3976_p9 = scmp.lt.u32.totalorder %s3972_s27, %s4925_s1 }
  0x17   :  { %p3978_p10 = pnand %p3976_p9, %p3973_p8 }
  0x19   :  { %3981 = shalt.err (!%p3978_p10)
}
  0x1a   :  { %s3982_s4 = scalar_lea.vmem %s28_s24, 11520  ;;  %p3987_p12 = scmp.lt.s32.totalorder %s28_s24, %s28_s24 }
  0x1b   :  { %p3983_p11 = scmp.ne.s32.totalorder %s28_s24, %s3982_s4  ;;  %p3988_p13 = scmp.lt.s32.totalorder %s3982_s4, %s3982_s4 }
  0x1d   :  { %p3989_p0 = por %p3988_p13, %p3987_p12 }
  0x1f   :  { %p3990_p1 = pnand %p3989_p0, %p3983_p11 }
  0x21   :  { %3993 = shalt.err (!%p3990_p1)
}
  0x22   :  { %33 = dma.hbm_to_vmem [thread:$0]  %s4925_s1, 11520, %s28_s24, [#allocation6], %s4023_s19, %s4023_s19, %s4024_s20  }
  0x23   :  { %4016 = dma.done.wait [#allocation3], 512  }
  0x24   :  { %4017 = vsyncadd [#allocation3], 4294966784 }
  0x25   :  { %4018 = dma.done.wait [#allocation6], 11520  }
  0x26   :  { %4019 = vsyncadd [#allocation6], 4294955776  ;;  %v44_v0 = vld [vmem:[#allocation5] sm:$0xff]  ;;  %v45_v1 = vld [vmem:[#allocation5 + $0x8] sm:$0xff]  ;;  %vm173_vm0 = vcmask 261120   ;;  %s4026_s1 = smov 32  }
  0x27   :  { %v46_v2 = vld [vmem:[#allocation5 + $0x10] sm:$0xff]  ;;  %v3354_v3 = vpack.c.bf16 %v45_v1, %v44_v0  ;;  %v47_v4 = vld [vmem:[#allocation5 + $0x18] sm:$0xff]  ;;  %v48_v6 = vld [vmem:[#allocation5 + $0x20] sm:$0xff]  ;;  %s4027_s6 = smov 96   ;;  %s4028_s7 = smov 64   ;;  %vm1316_vm2 = vcmask 523264  }
  0x28   :  { %v3358_v5 = vpack.c.bf16 %v47_v4, %v46_v2  ;;  %v49_v7 = vld [vmem:[#allocation5 + $0x28] sm:$0xff]  ;;  %v40_v9 = vld [vmem:[#allocation2] sm:$0xff]  ;;  %v50_v10 = vld [vmem:[#allocation5 + $0x30] sm:$0xff]  ;;  %s4029_s8 = smov [#allocation7]  }
  0x29   :  { %3355 = vmatprep.subr.bf16.mxu0 %v3354_v3  ;;  %v3362_v8 = vpack.c.bf16 %v49_v7, %v48_v6  ;;  %v51_v11 = vld [vmem:[#allocation5 + $0x38] sm:$0xff]  ;;  %2992 = vmatprep.mubr.f32.mxu0 %v40_v9  ;;  %v52_v13 = vld [vmem:[#allocation5 + $0x40] sm:$0xff]  ;;  %v53_v14 = vld [vmem:[#allocation5 + $0x48] sm:$0xff]  ;;  %s2645_s9 = sshll.u32 %s4029_s8, 4  ;;  %s2646_s9 = int_to_ptr.vmem [resolvable:$true] %s2645_s9 }
  0x2a   :  { %3357 = vmatpush3.bf16.msra.mxu0 %v3354_v3  ;;  %v3366_v12 = vpack.c.bf16 %v51_v11, %v50_v10  ;;  %v3370_v15 = vpack.c.bf16 %v53_v14, %v52_v13  ;;  %v54_v16 = vld [vmem:[#allocation5 + $0x50] sm:$0xff]  ;;  %v55_v17 = vld [vmem:[#allocation5 + $0x58] sm:$0xff]  ;;  %v56_v19 = vld [vmem:[#allocation5 + $0x60] sm:$0xff]  ;;  %s3994_s10 = scalar_lea.vmem %s2646_s9, 512  ;;  %p3999_p3 = scmp.lt.s32.totalorder %s2646_s9, %s2646_s9 }
  0x2b   :  { %3359 = vmatprep.subr.bf16.mxu0 %v3358_v5  ;;  %v3374_v18 = vpack.c.bf16 %v55_v17, %v54_v16  ;;  %v57_v20 = vld [vmem:[#allocation5 + $0x68] sm:$0xff]  ;;  %v58_v22 = vld [vmem:[#allocation5 + $0x70] sm:$0xff]  ;;  %v59_v23 = vld [vmem:[#allocation5 + $0x78] sm:$0xff]  ;;  %p3995_p2 = scmp.ne.s32.totalorder %s2646_s9, %s3994_s10  ;;  %p4000_p4 = scmp.lt.s32.totalorder %s3994_s10, %s3994_s10 }
  0x2c   :  { %v3378_v21 = vpack.c.bf16 %v57_v20, %v56_v19  ;;  %v3382_v24 = vpack.c.bf16 %v59_v23, %v58_v22  ;;  %v41_v25 = vld [vmem:[#allocation2 + $0x8] sm:$0xff]  ;;  %v42_v26 = vld [vmem:[#allocation2 + $0x10] sm:$0xff]  ;;  %v43_v27 = vld [vmem:[#allocation2 + $0x18] sm:$0xff] }
  0x2d   :  { %v145_v28 = vld [vmem:[#allocation5 + $0x80] sm:$0xff]  ;;  %v146_v30 = vld [vmem:[#allocation5 + $0x88] sm:$0xff]  ;;  %v148_v33 = vld [vmem:[#allocation5 + $0x98] sm:$0xff]  ;;  %p4001_p5 = por %p4000_p4, %p3999_p3 }
  0x2e   :  { %3361 = vmatpush3.bf16.msra.mxu0 %v3358_v5  ;;  %v147_v34 = vld [vmem:[#allocation5 + $0x90] sm:$0xff]  ;;  %v227_v0 = vld [vmem:[#allocation5 + $0x140] sm:$0xff]  ;;  %v228_v1 = vld [vmem:[#allocation5 + $0x148] sm:$0xff] }
  0x2f   :  { %3363 = vmatprep.subr.bf16.mxu0 %v3362_v8  ;;  %v3386_v2 = vpack.c.bf16 %v228_v1, %v227_v0  ;;  %v229_v3 = vld [vmem:[#allocation5 + $0x150] sm:$0xff]  ;;  %v230_v4 = vld [vmem:[#allocation5 + $0x158] sm:$0xff]  ;;  %v4115_v6 = vld [vmem:[#allocation5 + $0xc8] sm:$0xff]  ;;  %p4002_p6 = pnand %p4001_p5, %p3995_p2 }
  0x30   :  { %v3390_v5 = vpack.c.bf16 %v230_v4, %v229_v3  ;;  %v4119_v7 = vld [vmem:[#allocation5 + $0xd0] sm:$0xff]  ;;  %v4123_v9 = vld [vmem:[#allocation5 + $0xc0] sm:$0xff]  ;;  %v4140_v13 = vld [vmem:[#allocation5 + $0xe8] sm:$0xff] }
  0x31   :  { %3387 = vmatprep.subr.bf16.mxu1 %v3386_v2  ;;  %v4131_v11 = vpack.c.bf16 %v4115_v6, %v4123_v9  ;;  %v4154_v16 = vld [vmem:[#allocation5 + $0xf8] sm:$0xff]  ;;  %v4168_v19 = vld [vmem:[#allocation5 + $0x108] sm:$0xff]  ;;  %v2658_v0 = vld [vmem:[#allocation5 + $0x160] ss:$0 sm:$0xff] }
  0x32   :  { %3365 = vmatpush3.bf16.msra.mxu0 %v3362_v8  ;;  %3389 = vmatpush3.bf16.msra.mxu1 %v3386_v2  ;;  %v4121_v8 = vld [vmem:[#allocation5 + $0xd8] sm:$0xff]  ;;  %vm4351_vm1 = vmpackc.low %vm173_vm0, %vm173_vm0 }
  0x33   :  { %3367 = vmatprep.subr.bf16.mxu0 %v3366_v12  ;;  %3391 = vmatprep.subr.bf16.mxu1 %v3390_v5  ;;  %v4127_v10 = vpack.c.bf16 %v4121_v8, %v4119_v7  ;;  %v4182_v22 = vld [vmem:[#allocation5 + $0x118] sm:$0xff] }
  0x36   :  { %3369 = vmatpush3.bf16.msra.mxu0 %v3366_v12  ;;  %3393 = vmatpush3.bf16.msra.mxu1 %v3390_v5  ;;  %v4135_v12 = vld [vmem:[#allocation5 + $0xe0] sm:$0xff] }
  0x37   :  { %3371 = vmatprep.subr.bf16.mxu0 %v3370_v15  ;;  %v4145_v14 = vpack.c.bf16 %v4140_v13, %v4135_v12 }
  0x3a   :  { %3373 = vmatpush3.bf16.msra.mxu0 %v3370_v15  ;;  %v4150_v15 = vld [vmem:[#allocation5 + $0xf0] sm:$0xff] }
  0x3b   :  { %3375 = vmatprep.subr.bf16.mxu0 %v3374_v18  ;;  %v4159_v17 = vpack.c.bf16 %v4154_v16, %v4150_v15 }
  0x3e   :  { %3377 = vmatpush3.bf16.msra.mxu0 %v3374_v18  ;;  %v4164_v18 = vld [vmem:[#allocation5 + $0x100] sm:$0xff] }
  0x3f   :  { %3379 = vmatprep.subr.bf16.mxu0 %v3378_v21  ;;  %v4173_v20 = vpack.c.bf16 %v4168_v19, %v4164_v18 }
  0x42   :  { %3381 = vmatpush3.bf16.msra.mxu0 %v3378_v21  ;;  %v4178_v21 = vld [vmem:[#allocation5 + $0x110] sm:$0xff] }
  0x43   :  { %3383 = vmatprep.subr.bf16.mxu0 %v3382_v24  ;;  %v4187_v23 = vpack.c.bf16 %v4182_v22, %v4178_v21 }
  0x46   :  { %3385 = vmatpush3.bf16.msra.mxu0 %v3382_v24  ;;  %v4192_v24 = vld [vmem:[#allocation5 + $0x120] sm:$0xff] }
  0x47   :  { %3443 = vmatprep.subr.bf16.mxu0 %v4131_v11 }
  0x49   :  { %2993 = vmatmul.mubr.f32.vlgmr.msra.gmra.mrb[0].mxu0 %v41_v25  ;;  %v4196_v25 = vld [vmem:[#allocation5 + $0x128] sm:$0xff] }
  0x4a   :  { %2995 = vmatprep.mubr.f32.mxu0 %v42_v26  ;;  %3445 = vmatpush3.bf16.msra.mxu0 %v4131_v11  ;;  %v4201_v26 = vpack.c.bf16 %v4196_v25, %v4192_v24 }
  0x4b   :  { %3447 = vmatprep.subr.bf16.mxu0 %v4127_v10 }
  0x4d   :  { %2996 = vmatmul.mubr.f32.gmra.mrb[2].mxu0 %v43_v27  ;;  %v4206_v27 = vld [vmem:[#allocation5 + $0x130] sm:$0xff] }
  0x4e   :  { %3449 = vmatpush3.bf16.msra.mxu0 %v4127_v10 }
  0x4f   :  { %3451 = vmatprep.subr.bf16.mxu0 %v4145_v14 }
  0x52   :  { %3453 = vmatpush3.bf16.msra.mxu0 %v4145_v14 }
  0x53   :  { %3455 = vmatprep.subr.bf16.mxu0 %v4159_v17 }
  0x56   :  { %3457 = vmatpush3.bf16.msra.mxu0 %v4159_v17 }
  0x57   :  { %3459 = vmatprep.subr.bf16.mxu0 %v4173_v20 }
  0x5a   :  { %3461 = vmatpush3.bf16.msra.mxu0 %v4173_v20 }
  0x5b   :  { %3463 = vmatprep.subr.bf16.mxu0 %v4187_v23 }
  0x5e   :  { %3465 = vmatpush3.bf16.msra.mxu0 %v4187_v23 }
  0x5f   :  { %3467 = vmatprep.subr.bf16.mxu0 %v4201_v26 }
  0x62   :  { %3469 = vmatpush3.bf16.msra.mxu0 %v4201_v26 }
 0x11c   :  { %v2994_v29 = vpop.f32.mrb[0].mxu0 }
 0x11d   :  { %v126_v31 = vpop.f32.mrb[1].mxu0  ;;  %v4077_v35 = vadd.f32 %v2994_v29, %v146_v30 }
 0x11e   :  { %v4075_v32 = vadd.f32 %v145_v28, %v126_v31  ;;  %v4210_v28 = vld [vmem:[#allocation5 + $0x138] sm:$0xff] }
 0x11f   :  { %v177_v41 = vsel %vm173_vm0, %v4077_v35, 0.0  ;;  %v4215_v29 = vpack.c.bf16 %v4210_v28, %v4206_v27 }
 0x120   :  { %v2997_v36 = vpop.f32.mrb[2].mxu0  ;;  %v174_v37 = vsel %vm173_vm0, %v4075_v32, 0.0 }
 0x121   :  { %175 = vadd.xlane.f32.xlu0 %v174_v37  ;;  %v136_v38 = vpop.f32.mrb[3].mxu0  ;;  %v4081_v39 = vadd.f32 %v2997_v36, %v148_v33  ;;  %3471 = vmatprep.subr.bf16.mxu0 %v4215_v29 }
 0x122   :  { %v4083_v40 = vadd.f32 %v147_v34, %v136_v38  ;;  %3473 = vmatpush3.bf16.msra.mxu0 %v4215_v29 }
 0x123   :  { %v183_v43 = vsel %vm173_vm0, %v4081_v39, 0.0 }
 0x124   :  { %v180_v42 = vsel %vm173_vm0, %v4083_v40, 0.0 }
 0x125   :  { %178 = vadd.xlane.f32.xlu0 %v177_v41  ;;  %181 = vadd.xlane.f32.xlu1 %v180_v42 }
 0x129   :  { %184 = vadd.xlane.f32.xlu1 %v183_v43 }
 0x1ae   :  { %v176_v44 = vpop.xlane.xlu0 %175 }
 0x1af   :  { %v187_v45 = vmul.f32 0.03125, %v176_v44 }
 0x1b1   :  { %v4092_v46 = vsub.f32 %v4075_v32, %v187_v45 }
 0x1b2   :  { %v179_v47 = vpop.xlane.xlu0 %178  ;;  %v182_v48 = vpop.xlane.xlu1 %181 }
 0x1b3   :  { %v188_v49 = vmul.f32 0.03125, %v179_v47  ;;  %v189_v50 = vmul.f32 0.03125, %v182_v48  ;;  %v195_v51 = vmul.f32 %v4092_v46, %v4092_v46 }
 0x1b5   :  { %v4097_v52 = vsub.f32 %v4077_v35, %v188_v49  ;;  %v4100_v53 = vsub.f32 %v4083_v40, %v189_v50  ;;  %v199_v54 = vsel %vm173_vm0, %v195_v51, 0.0 }
 0x1b6   :  { %200 = vadd.xlane.f32.xlu0 %v199_v54  ;;  %v185_v55 = vpop.xlane.xlu1 %184 }
 0x1b7   :  { %v190_v56 = vmul.f32 0.03125, %v185_v55  ;;  %v196_v57 = vmul.f32 %v4097_v52, %v4097_v52  ;;  %v197_v58 = vmul.f32 %v4100_v53, %v4100_v53 }
 0x1b9   :  { %v4108_v59 = vsub.f32 %v4081_v39, %v190_v56  ;;  %v202_v60 = vsel %vm173_vm0, %v196_v57, 0.0  ;;  %v205_v61 = vsel %vm173_vm0, %v197_v58, 0.0 }
 0x1ba   :  { %203 = vadd.xlane.f32.xlu1 %v202_v60  ;;  %206 = vadd.xlane.f32.xlu0 %v205_v61 }
 0x1bb   :  { %v198_v62 = vmul.f32 %v4108_v59, %v4108_v59 }
 0x1bd   :  { %v208_v63 = vsel %vm173_vm0, %v198_v62, 0.0 }
 0x1be   :  { %209 = vadd.xlane.f32.xlu1 %v208_v63 }
 0x1cf   :  { %351 = vrot.lane.b32.xlu1 %v4115_v6, %s4026_s1 }
 0x1d0   :  { %349 = vrot.lane.b32.xlu0 %v4123_v9, %s4026_s1 }
 0x1d3   :  { %353 = vrot.lane.b32.xlu1 %v4119_v7, %s4026_s1 }
 0x1d4   :  { %357 = vrot.lane.b32.xlu0 %v4135_v12, %s4026_s1 }
 0x1d7   :  { %355 = vrot.lane.b32.xlu1 %v4121_v8, %s4026_s1 }
 0x1d8   :  { %361 = vrot.lane.b32.xlu0 %v4150_v15, %s4026_s1 }
 0x1db   :  { %359 = vrot.lane.b32.xlu1 %v4140_v13, %s4026_s1 }
 0x1dc   :  { %365 = vrot.lane.b32.xlu0 %v4164_v18, %s4026_s1 }
 0x1df   :  { %363 = vrot.lane.b32.xlu1 %v4154_v16, %s4026_s1 }
 0x1e0   :  { %369 = vrot.lane.b32.xlu0 %v4178_v21, %s4026_s1 }
 0x1e3   :  { %367 = vrot.lane.b32.xlu1 %v4168_v19, %s4026_s1 }
 0x1e4   :  { %373 = vrot.lane.b32.xlu0 %v4192_v24, %s4026_s1 }
 0x1e7   :  { %371 = vrot.lane.b32.xlu1 %v4182_v22, %s4026_s1 }
 0x1e8   :  { %377 = vrot.lane.b32.xlu0 %v4206_v27, %s4026_s1 }
 0x1eb   :  { %375 = vrot.lane.b32.xlu1 %v4196_v25, %s4026_s1 }
 0x1ef   :  { %379 = vrot.lane.b32.xlu1 %v4210_v28, %s4026_s1 }
 0x243   :  { %v201_v30 = vpop.xlane.xlu0 %200 }
 0x244   :  { %v211_v31 = vmul.f32 0.03125, %v201_v30 }
 0x246   :  { %v215_v33 = vadd.f32 1e-06, %v211_v31 }
 0x247   :  { %v207_v34 = vpop.xlane.xlu0 %206  ;;  %v204_v36 = vpop.xlane.xlu1 %203 }
 0x248   :  { %3858 = vrsqrt.f32 %v215_v33  ;;  %v213_v37 = vmul.f32 0.03125, %v207_v34  ;;  %v212_v38 = vmul.f32 0.03125, %v204_v36 }
 0x24a   :  { %v217_v41 = vadd.f32 1e-06, %v213_v37  ;;  %v216_v42 = vadd.f32 1e-06, %v212_v38 }
 0x24b   :  { %v210_v43 = vpop.xlane.xlu1 %209  ;;  %v4241_v60 = vpop.permute.xlu0 %349 }
 0x24c   :  { %3860 = vrsqrt.f32 %v217_v41  ;;  %v214_v44 = vmul.f32 0.03125, %v210_v43 }
 0x24d   :  { %3862 = vrsqrt.f32 %v216_v42 }
 0x24e   :  { %v218_v45 = vadd.f32 1e-06, %v214_v44 }
 0x24f   :  { %v4235_v57 = vpop.permute.xlu1 %351 }
 0x250   :  { %3864 = vrsqrt.f32 %v218_v45 }
 0x252   :  { %v3859_v47 = vpop.eup %3858 }
 0x253   :  { %v223_v48 = vmul.f32 %v3859_v47, %v4092_v46  ;;  %v4237_v46 = vpop.permute.xlu1 %353 }
 0x255   :  { %3006 = vmatprep.mubr.msk.f32.mxu1 %vm173_vm0, %v223_v48 }
 0x256   :  { %v3861_v49 = vpop.eup %3860 }
 0x257   :  { %v3863_v50 = vpop.eup %3862  ;;  %v225_v51 = vmul.f32 %v3861_v49, %v4100_v53  ;;  %v4239_v58 = vpop.permute.xlu1 %355 }
 0x258   :  { %v224_v54 = vmul.f32 %v3863_v50, %v4097_v52  ;;  %v4245_v52 = vpop.permute.xlu0 %357 }
 0x25a   :  { %v3865_v55 = vpop.eup %3864  ;;  %3007 = vmatmul.mubr.msk.f32.vlgmr.msra.gmra.mrb[0].mxu1 %vm173_vm0, %v224_v54 }
 0x25b   :  { %3009 = vmatprep.mubr.msk.f32.mxu1 %vm173_vm0, %v225_v51  ;;  %v226_v56 = vmul.f32 %v3865_v55, %v4108_v59  ;;  %v4243_v53 = vpop.permute.xlu1 %359 }
 0x25c   :  { %v4249_v62 = vpop.permute.xlu0 %361 }
 0x25e   :  { %3010 = vmatmul.mubr.msk.f32.gmra.mrb[2].mxu1 %vm173_vm0, %v226_v56 }
 0x25f   :  { %v4247_v61 = vpop.permute.xlu1 %363 }
 0x260   :  { %v4253_v59 = vpop.permute.xlu0 %365 }
 0x263   :  { %v4251_v63 = vpop.permute.xlu1 %367 }
 0x264   :  { %v4261_v30 = vpop.permute.xlu0 %369 }
 0x267   :  { %v4259_v5 = vpop.permute.xlu1 %371 }
 0x268   :  { %v4284_v48 = vpop.permute.xlu0 %373 }
 0x26b   :  { %v4282_v47 = vpop.permute.xlu1 %375 }
 0x32d   :  { %v3008_v1 = vpop.f32.mrb[0].mxu1 }
 0x32e   :  { %v4255_v2 = vadd.f32 %v3008_v1, %v2658_v0  ;;  %v314_v3 = vpop.f32.mrb[1].mxu1 }
 0x32f   :  { %v4257_v4 = vadd.f32 %v2658_v0, %v314_v3 }
 0x330   :  { %v398_v31 = vmul.f32 %v4235_v57, %v4255_v2  ;;  %v402_v43 = vmul.f32 %v4243_v53, %v4255_v2  ;;  %v406_v50 = vmul.f32 %v4251_v63, %v4255_v2 }
 0x331   :  { %v3011_v33 = vpop.f32.mrb[2].mxu1  ;;  %3044 = vmatprep.mubr.msk.f32.mxu1 %vm173_vm0, %v4257_v4  ;;  %v397_v34 = vmul.f32 %v4241_v60, %v4257_v4  ;;  %v401_v42 = vmul.f32 %v4245_v52, %v4257_v4  ;;  %v405_v49 = vmul.f32 %v4253_v59, %v4257_v4  ;;  %v409_v1 = vmul.f32 %v4284_v48, %v4257_v4 }
 0x332   :  { %v4269_v36 = vadd.f32 %v3011_v33, %v2658_v0  ;;  %v324_v37 = vpop.f32.mrb[3].mxu1 }
 0x333   :  { %v4271_v38 = vadd.f32 %v2658_v0, %v324_v37  ;;  %v3698_v41 = vpack.i.bf16 %v398_v31, %v397_v34  ;;  %v3708_v54 = vpack.i.bf16 %v402_v43, %v401_v42  ;;  %v410_v0 = vmul.f32 %v4282_v47, %v4255_v2  ;;  %v4304_v37 = vpop.permute.xlu1 %379 }
 0x334   :  { %v400_v44 = vmul.f32 %v4239_v58, %v4269_v36  ;;  %v404_v56 = vmul.f32 %v4247_v61, %v4269_v36  ;;  %v3718_v31 = vpack.i.bf16 %v406_v50, %v405_v49  ;;  %v408_v34 = vmul.f32 %v4259_v5, %v4269_v36 }
 0x335   :  { %3699 = vrot.lane.b32.xlu0 %v3698_v41, %s4027_s6  ;;  %v399_v45 = vmul.f32 %v4237_v46, %v4271_v38  ;;  %v403_v55 = vmul.f32 %v4249_v62, %v4271_v38  ;;  %v407_v33 = vmul.f32 %v4261_v30, %v4271_v38  ;;  %v4306_v41 = vpop.permute.xlu0 %377  ;;  %v3728_v42 = vpack.i.bf16 %v410_v0, %v409_v1 }
 0x336   :  { %v412_v43 = vmul.f32 %v4304_v37, %v4269_v36 }
 0x337   :  { %v3703_v51 = vpack.i.bf16 %v400_v44, %v399_v45  ;;  %v3713_v3 = vpack.i.bf16 %v404_v56, %v403_v55  ;;  %v411_v44 = vmul.f32 %v4306_v41, %v4271_v38  ;;  %v3723_v45 = vpack.i.bf16 %v408_v34, %v407_v33 }
 0x339   :  { %3704 = vrot.lane.b32.xlu1 %v3703_v51, %s4027_s6  ;;  %3709 = vrot.lane.b32.xlu0 %v3708_v54, %s4027_s6  ;;  %v3733_v49 = vpack.i.bf16 %v412_v43, %v411_v44 }
 0x33d   :  { %3714 = vrot.lane.b32.xlu1 %v3713_v3, %s4027_s6  ;;  %3719 = vrot.lane.b32.xlu0 %v3718_v31, %s4027_s6 }
 0x341   :  { %3724 = vrot.lane.b32.xlu1 %v3723_v45, %s4027_s6  ;;  %3729 = vrot.lane.b32.xlu0 %v3728_v42, %s4027_s6 }
 0x345   :  { %413 = vrot.lane.b32.xlu0 %v4123_v9, %s4028_s7  ;;  %3734 = vrot.lane.b32.xlu1 %v3733_v49, %s4027_s6  ;;  %v4942_v9 = vmov 0 }
 0x346   :  { %v4943_v9 = vsel %vm4351_vm1, 4294967295, %v4942_v9 }
 0x347   :  { %4944 = vst [vmem:[#allocation11_spill] sm:$0xff] %v4943_v9 }
 0x349   :  { %417 = vrot.lane.b32.xlu0 %v4119_v7, %s4028_s7  ;;  %415 = vrot.lane.b32.xlu1 %v4115_v6, %s4028_s7 }
 0x34d   :  { %421 = vrot.lane.b32.xlu0 %v4135_v12, %s4028_s7  ;;  %419 = vrot.lane.b32.xlu1 %v4121_v8, %s4028_s7 }
 0x351   :  { %425 = vrot.lane.b32.xlu0 %v4150_v15, %s4028_s7  ;;  %423 = vrot.lane.b32.xlu1 %v4140_v13, %s4028_s7 }
 0x355   :  { %429 = vrot.lane.b32.xlu0 %v4164_v18, %s4028_s7  ;;  %427 = vrot.lane.b32.xlu1 %v4154_v16, %s4028_s7 }
 0x359   :  { %433 = vrot.lane.b32.xlu0 %v4178_v21, %s4028_s7  ;;  %431 = vrot.lane.b32.xlu1 %v4168_v19, %s4028_s7 }
 0x35d   :  { %437 = vrot.lane.b32.xlu0 %v4192_v24, %s4028_s7  ;;  %435 = vrot.lane.b32.xlu1 %v4182_v22, %s4028_s7 }
 0x361   :  { %441 = vrot.lane.b32.xlu0 %v4206_v27, %s4028_s7  ;;  %439 = vrot.lane.b32.xlu1 %v4196_v25, %s4028_s7 }
 0x365   :  { %443 = vrot.lane.b32.xlu1 %v4210_v28, %s4028_s7 }
 0x3a7   :  { %v3700_v6 = vpop.permute.xlu0 %3699 }
 0x3a8   :  { %v3702_v7 = vunpack.i.h.bf16 %v3700_v6  ;;  %v3701_v8 = vunpack.i.l.bf16 %v3700_v6 }
 0x3aa   :  { %v3394_v12 = vpack.c.bf16 %v3702_v7, %v3701_v8 }
 0x3ab   :  { %v3710_v13 = vpop.permute.xlu0 %3709  ;;  %v3705_v15 = vpop.permute.xlu1 %3704 }
 0x3ac   :  { %v3707_v16 = vunpack.i.h.bf16 %v3705_v15  ;;  %v3706_v18 = vunpack.i.l.bf16 %v3705_v15  ;;  %3396 = vmatprep.subr.msk.bf16.mxu1 %vm4351_vm1, %v3394_v12  ;;  %v3712_v24 = vunpack.i.h.bf16 %v3710_v13  ;;  %v3711_v25 = vunpack.i.l.bf16 %v3710_v13 }
 0x3ad   :  { %3399 = vmatpush3.bf16.xpose.msk.msra.mxu1 %vm4351_vm1, %v3394_v12 }
 0x3ae   :  { %v3400_v19 = vpack.c.bf16 %v3707_v16, %v3706_v18  ;;  %v3406_v50 = vpack.c.bf16 %v3712_v24, %v3711_v25 }
 0x3af   :  { %v3720_v21 = vpop.permute.xlu0 %3719  ;;  %v3715_v22 = vpop.permute.xlu1 %3714 }
 0x3b0   :  { %3402 = vmatprep.subr.msk.bf16.mxu1 %vm4351_vm1, %v3400_v19  ;;  %v3717_v55 = vunpack.i.h.bf16 %v3715_v22  ;;  %v3716_v56 = vunpack.i.l.bf16 %v3715_v22  ;;  %v3722_v44 = vunpack.i.h.bf16 %v3720_v21  ;;  %v3721_v45 = vunpack.i.l.bf16 %v3720_v21 }
 0x3b2   :  { %v3412_v3 = vpack.c.bf16 %v3717_v55, %v3716_v56  ;;  %v3418_v12 = vpack.c.bf16 %v3722_v44, %v3721_v45 }
 0x3b3   :  { %v3730_v27 = vpop.permute.xlu0 %3729  ;;  %v3725_v28 = vpop.permute.xlu1 %3724 }
 0x3b4   :  { %v3727_v21 = vunpack.i.h.bf16 %v3725_v28  ;;  %v3726_v22 = vunpack.i.l.bf16 %v3725_v28  ;;  %v3732_v56 = vunpack.i.h.bf16 %v3730_v27  ;;  %v3731_v28 = vunpack.i.l.bf16 %v3730_v27 }
 0x3b5   :  { %3405 = vmatpush3.bf16.xpose.msk.msra.mxu1 %vm4351_vm1, %v3400_v19 }
 0x3b6   :  { %3408 = vmatprep.subr.msk.bf16.mxu1 %vm4351_vm1, %v3406_v50  ;;  %v3424_v55 = vpack.c.bf16 %v3727_v21, %v3726_v22 }
 0x3b7   :  { %v4365_v51 = vpop.permute.xlu0 %413  ;;  %v3735_v54 = vpop.permute.xlu1 %3734 }
 0x3b8   :  { %v461_v31 = vmul.f32 %v4365_v51, %v4257_v4 }
 0x3bb   :  { %v4367_v0 = vpop.permute.xlu0 %417  ;;  %v4369_v1 = vpop.permute.xlu1 %415 }
 0x3bc   :  { %v462_v33 = vmul.f32 %v4369_v1, %v4255_v2  ;;  %v463_v49 = vmul.f32 %v4367_v0, %v4271_v38 }
 0x3bd   :  { %3411 = vmatpush3.bf16.xpose.msk.msra.mxu1 %vm4351_vm1, %v3406_v50 }
 0x3be   :  { %v3738_v34 = vpack.i.bf16 %v462_v33, %v461_v31  ;;  %3414 = vmatprep.subr.msk.bf16.mxu1 %vm4351_vm1, %v3412_v3  ;;  %v3737_v31 = vunpack.i.h.bf16 %v3735_v54  ;;  %v3736_v33 = vunpack.i.l.bf16 %v3735_v54 }
 0x3bf   :  { %v4379_v42 = vpop.permute.xlu0 %421  ;;  %v4381_v43 = vpop.permute.xlu1 %419 }
 0x3c0   :  { %4945 = vst [vmem:[#allocation12_spill] sm:$0xff] %v4379_v42  ;;  %4946 = vst [vmem:[#allocation13_spill] sm:$0xff] %v4381_v43  ;;  %v464_v6 = vmul.f32 %v4381_v43, %v4269_v36  ;;  %3739 = vrot.lane.b32.xlu0 %v3738_v34, %s4028_s7  ;;  %v465_v13 = vmul.f32 %v4379_v42, %v4257_v4  ;;  %v3436_v34 = vpack.c.bf16 %v3737_v31, %v3736_v33 }
 0x3c2   :  { %v3748_v7 = vpack.i.bf16 %v464_v6, %v463_v49 }
 0x3c3   :  { %v4388_v8 = vpop.permute.xlu1 %423  ;;  %v4395_v16 = vpop.permute.xlu0 %425 }
 0x3c4   :  { %4947 = vst [vmem:[#allocation14_spill] sm:$0xff] %v4388_v8  ;;  %v466_v15 = vmul.f32 %v4388_v8, %v4255_v2  ;;  %3749 = vrot.lane.b32.xlu1 %v3748_v7, %s4028_s7  ;;  %4948 = vst [vmem:[#allocation15_spill] sm:$0xff] %v4395_v16  ;;  %v467_v24 = vmul.f32 %v4395_v16, %v4271_v38 }
 0x3c5   :  { %3417 = vmatpush3.bf16.xpose.msk.msra.mxu1 %vm4351_vm1, %v3412_v3  ;;  %v3430_v3 = vpack.c.bf16 %v3732_v56, %v3731_v28 }
 0x3c6   :  { %v3743_v18 = vpack.i.bf16 %v466_v15, %v465_v13  ;;  %3420 = vmatprep.subr.msk.bf16.mxu1 %vm4351_vm1, %v3418_v12  ;;  %v154_v13 = vld [vmem:[#allocation5 + $0xa8] sm:$0xff]  ;;  %v153_v15 = vld [vmem:[#allocation5 + $0xa0] sm:$0xff] }
 0x3c7   :  { %v4401_v19 = vpop.permute.xlu1 %427  ;;  %v4429_v27 = vpop.permute.xlu0 %429 }
 0x3c8   :  { %4949 = vst [vmem:[#allocation16_spill] sm:$0xff] %v4401_v19  ;;  %v468_v25 = vmul.f32 %v4401_v19, %v4269_v36  ;;  %3744 = vrot.lane.b32.xlu0 %v3743_v18, %s4028_s7  ;;  %4950 = vst [vmem:[#allocation17_spill] sm:$0xff] %v4429_v27 }
 0x3ca   :  { %v3753_v50 = vpack.i.bf16 %v468_v25, %v467_v24 }
 0x3cb   :  { %v4431_v54 = vpop.permute.xlu0 %433 }
 0x3cc   :  { %3754 = vrot.lane.b32.xlu1 %v3753_v50, %s4028_s7  ;;  %4951 = vst [vmem:[#allocation18_spill] sm:$0xff] %v4431_v54  ;;  %v4437_v50 = vpop.permute.xlu1 %431 }
 0x3cd   :  { %3423 = vmatpush3.bf16.xpose.msk.msra.mxu1 %vm4351_vm1, %v3418_v12  ;;  %4954 = vst [vmem:[#allocation21_spill] sm:$0xff] %v4437_v50  ;;  %v470_v33 = vmul.f32 %v4437_v50, %v4255_v2 }
 0x3ce   :  { %3426 = vmatprep.subr.msk.bf16.mxu1 %vm4351_vm1, %v3424_v55 }
 0x3cf   :  { %v4433_v44 = vpop.permute.xlu0 %437 }
 0x3d0   :  { %4952 = vst [vmem:[#allocation19_spill] sm:$0xff] %v4433_v44  ;;  %v4439_v56 = vpop.permute.xlu1 %435 }
 0x3d1   :  { %4955 = vst [vmem:[#allocation22_spill] sm:$0xff] %v4439_v56  ;;  %v472_v28 = vmul.f32 %v4439_v56, %v4269_v36 }
 0x3d3   :  { %v4435_v45 = vpop.permute.xlu0 %441 }
 0x3d4   :  { %4953 = vst [vmem:[#allocation20_spill] sm:$0xff] %v4435_v45 }
 0x3d5   :  { %3429 = vmatpush3.bf16.xpose.msk.msra.mxu1 %vm4351_vm1, %v3424_v55 }
 0x3d6   :  { %3432 = vmatprep.subr.msk.bf16.mxu1 %vm4351_vm1, %v3430_v3 }
 0x3dd   :  { %3435 = vmatpush3.bf16.xpose.msk.msra.mxu1 %vm4351_vm1, %v3430_v3  ;;  %v471_v3 = vmul.f32 %v4431_v54, %v4271_v38 }
 0x3de   :  { %3438 = vmatprep.subr.msk.bf16.mxu1 %vm4351_vm1, %v3436_v34 }
 0x3df   :  { %v3763_v31 = vpack.i.bf16 %v472_v28, %v471_v3  ;;  %v475_v3 = vmul.f32 %v4435_v45, %v4271_v38 }
 0x3e5   :  { %3441 = vmatpush3.bf16.xpose.msk.msra.mxu1 %vm4351_vm1, %v3436_v34  ;;  %v469_v34 = vmul.f32 %v4429_v27, %v4257_v4 }
 0x3ec   :  { %3045 = vmatmul.mubr.msk.f32.vlgmr.msra.gmra.mrb[4].mxu1 %vm173_vm0, %v4255_v2 }
 0x3ed   :  { %3047 = vmatprep.mubr.msk.f32.mxu1 %vm173_vm0, %v4271_v38 }
 0x3f0   :  { %3048 = vmatmul.mubr.msk.f32.gmra.mrb[6].mxu1 %vm173_vm0, %v4269_v36 }
 0x432   :  { %v3740_v49 = vpop.permute.xlu0 %3739 }
 0x433   :  { %v3742_v6 = vunpack.i.h.bf16 %v3740_v49  ;;  %v3741_v7 = vunpack.i.l.bf16 %v3740_v49  ;;  %v3758_v49 = vpack.i.bf16 %v470_v33, %v469_v34 }
 0x435   :  { %v3474_v12 = vpack.c.bf16 %v3742_v6, %v3741_v7  ;;  %v156_v6 = vld [vmem:[#allocation5 + $0xb8] sm:$0xff]  ;;  %v155_v7 = vld [vmem:[#allocation5 + $0xb0] sm:$0xff] }
 0x437   :  { %3475 = vmatprep.subr.bf16.mxu0 %v3474_v12 }
 0x4bf   :  { %v3046_v18 = vpop.f32.mrb[4].mxu1 }
 0x4c0   :  { %v641_v21 = vadd.f32 %v3046_v18, %v154_v13  ;;  %v635_v22 = vpop.f32.mrb[5].mxu1  ;;  %v4451_v18 = vpop.permute.xlu1 %439 }
 0x4c1   :  { %v636_v24 = vadd.f32 %v635_v22, %v153_v15  ;;  %4956 = vst [vmem:[#allocation23_spill] sm:$0xff] %v4451_v18  ;;  %v474_v33 = vmul.f32 %v4451_v18, %v4255_v2 }
 0x4c2   :  { %656 = vmax.xlane.f32.xlu1 %v641_v21 }
 0x4c3   :  { %v3049_v25 = vpop.f32.mrb[6].mxu1  ;;  %654 = vmax.xlane.f32.xlu0 %v636_v24 }
 0x4c4   :  { %v645_v55 = vpop.f32.mrb[7].mxu1  ;;  %v651_v13 = vadd.f32 %v3049_v25, %v156_v6  ;;  %v4453_v22 = vpop.permute.xlu1 %443  ;;  %v473_v25 = vmul.f32 %v4433_v44, %v4257_v4 }
 0x4c5   :  { %v646_v15 = vadd.f32 %v645_v55, %v155_v7  ;;  %4957 = vst [vmem:[#allocation24_spill] sm:$0xff] %v4453_v22  ;;  %v476_v28 = vmul.f32 %v4453_v22, %v4269_v36  ;;  %v3745_v6 = vpop.permute.xlu0 %3744 }
 0x4c6   :  { %v3768_v55 = vpack.i.bf16 %v474_v33, %v473_v25  ;;  %v3747_v33 = vunpack.i.h.bf16 %v3745_v6  ;;  %v3746_v25 = vunpack.i.l.bf16 %v3745_v6 }
 0x4c8   :  { %v3750_v34 = vpop.permute.xlu1 %3749 }
 0x4c9   :  { %v3752_v2 = vunpack.i.h.bf16 %v3750_v34 }
 0x4d3   :  { %3764 = vrot.lane.b32.xlu1 %v3763_v31, %s4028_s7  ;;  %v3773_v31 = vpack.i.bf16 %v476_v28, %v475_v3  ;;  %v3751_v3 = vunpack.i.l.bf16 %v3750_v34 }
 0x4d5   :  { %v3478_v4 = vpack.c.bf16 %v3752_v2, %v3751_v3 }
 0x4d9   :  { %3759 = vrot.lane.b32.xlu0 %v3758_v49, %s4028_s7  ;;  %v3755_v49 = vpop.permute.xlu1 %3754 }
 0x4da   :  { %v3757_v44 = vunpack.i.h.bf16 %v3755_v49 }
 0x4f7   :  { %660 = vmax.xlane.f32.xlu1 %v651_v13 }
 0x4f8   :  { %658 = vmax.xlane.f32.xlu0 %v646_v15 }
 0x508   :  { %3774 = vrot.lane.b32.xlu1 %v3773_v31, %s4028_s7 }
 0x50e   :  { %3769 = vrot.lane.b32.xlu0 %v3768_v55, %s4028_s7  ;;  %v3482_v55 = vpack.c.bf16 %v3747_v33, %v3746_v25 }
 0x54f   :  { %v657_v7 = vpop.xlane.xlu1 %656 }
 0x550   :  { %v663_v36 = vsub.f32 %v641_v21, %v657_v7  ;;  %v655_v22 = vpop.xlane.xlu0 %654  ;;  %v3756_v21 = vunpack.i.l.bf16 %v3755_v49 }
 0x551   :  { %v662_v56 = vsub.f32 %v636_v24, %v655_v22 }
 0x552   :  { %v668_v38 = vmul.f32 1.442695, %v663_v36  ;;  %v3486_v24 = vpack.c.bf16 %v3757_v44, %v3756_v21 }
 0x553   :  { %v666_v28 = vmul.f32 1.442695, %v662_v56  ;;  %v3765_v36 = vpop.permute.xlu1 %3764 }
 0x554   :  { %v3760_v7 = vpop.permute.xlu0 %3759  ;;  %v3767_v34 = vunpack.i.h.bf16 %v3765_v36 }
 0x555   :  { %3866 = vpow2.f32 %v666_v28  ;;  %v3762_v56 = vunpack.i.h.bf16 %v3760_v7  ;;  %v3761_v22 = vunpack.i.l.bf16 %v3760_v7 }
 0x556   :  { %3868 = vpow2.f32 %v668_v38  ;;  %v3766_v38 = vunpack.i.l.bf16 %v3765_v36 }
 0x557   :  { %v3490_v28 = vpack.c.bf16 %v3762_v56, %v3761_v22 }
 0x558   :  { %v3494_v6 = vpack.c.bf16 %v3767_v34, %v3766_v38  ;;  %v917_v34 = vld [vmem:[#allocation5 + $0x170] sm:$0xff] }
 0x55f   :  { %v3867_v31 = vpop.eup %3866 }
 0x560   :  { %v3869_v18 = vpop.eup %3868  ;;  %3082 = vmatprep.mubr.f32.mxu0 %v3867_v31 }
 0x561   :  { %3083 = vmatmul.mubr.f32.vlgmr.msra.gmra.mrb[4].mxu0 %v3869_v18 }
 0x562   :  { %3477 = vmatpush3.bf16.msra.mxu0 %v3474_v12 }
 0x563   :  { %3479 = vmatprep.subr.bf16.mxu0 %v3478_v4 }
 0x566   :  { %3481 = vmatpush3.bf16.msra.mxu0 %v3478_v4 }
 0x567   :  { %3483 = vmatprep.subr.bf16.mxu0 %v3482_v55 }
 0x56a   :  { %3485 = vmatpush3.bf16.msra.mxu0 %v3482_v55 }
 0x56b   :  { %3487 = vmatprep.subr.bf16.mxu0 %v3486_v24 }
 0x56e   :  { %3489 = vmatpush3.bf16.msra.mxu0 %v3486_v24 }
 0x56f   :  { %3491 = vmatprep.subr.bf16.mxu0 %v3490_v28 }
 0x572   :  { %3493 = vmatpush3.bf16.msra.mxu0 %v3490_v28  ;;  %v918_v28 = vld [vmem:[#allocation5 + $0x178] sm:$0xff] }
 0x573   :  { %3495 = vmatprep.subr.bf16.mxu0 %v3494_v6 }
 0x576   :  { %3497 = vmatpush3.bf16.msra.mxu0 %v3494_v6  ;;  %v919_v6 = vld [vmem:[#allocation5 + $0x180] sm:$0xff] }
 0x584   :  { %v661_v12 = vpop.xlane.xlu1 %660 }
 0x585   :  { %v665_v49 = vsub.f32 %v651_v13, %v661_v12  ;;  %v659_v2 = vpop.xlane.xlu0 %658  ;;  %v3510_v12 = vpack.c.bf16 %v919_v6, %v918_v28 }
 0x586   :  { %v664_v3 = vsub.f32 %v646_v15, %v659_v2  ;;  %v916_v15 = vld [vmem:[#allocation5 + $0x168] sm:$0xff] }
 0x587   :  { %v672_v4 = vmul.f32 1.442695, %v665_v49  ;;  %v3506_v38 = vpack.c.bf16 %v917_v34, %v916_v15  ;;  %v2687_v15 = vld [vmem:[#allocation5 + $0x188] ss:$0 sm:$0xff] }
 0x588   :  { %v670_v44 = vmul.f32 1.442695, %v664_v3  ;;  %v3775_v33 = vpop.permute.xlu1 %3774 }
 0x589   :  { %v3777_v25 = vunpack.i.h.bf16 %v3775_v33  ;;  %v3770_v21 = vpop.permute.xlu0 %3769  ;;  %v3776_v55 = vunpack.i.l.bf16 %v3775_v33  ;;  %3507 = vmatprep.subr.bf16.mxu1 %v3506_v38 }
 0x58a   :  { %3870 = vpow2.f32 %v670_v44  ;;  %v3772_v7 = vunpack.i.h.bf16 %v3770_v21  ;;  %v3771_v36 = vunpack.i.l.bf16 %v3770_v21  ;;  %3509 = vmatpush3.bf16.msra.mxu1 %v3506_v38 }
 0x58b   :  { %3872 = vpow2.f32 %v672_v4  ;;  %v3502_v56 = vpack.c.bf16 %v3777_v25, %v3776_v55  ;;  %3511 = vmatprep.subr.bf16.mxu1 %v3510_v12 }
 0x58c   :  { %v3498_v24 = vpack.c.bf16 %v3772_v7, %v3771_v36 }
 0x58e   :  { %3499 = vmatprep.subr.bf16.mxu0 %v3498_v24  ;;  %3513 = vmatpush3.bf16.msra.mxu1 %v3510_v12 }
 0x58f   :  { %3501 = vmatpush3.bf16.msra.mxu0 %v3498_v24 }
 0x590   :  { %3503 = vmatprep.subr.bf16.mxu0 %v3502_v56 }
 0x593   :  { %3505 = vmatpush3.bf16.msra.mxu0 %v3502_v56 }
 0x594   :  { %v3871_v22 = vpop.eup %3870 }
 0x595   :  { %v3873_v13 = vpop.eup %3872  ;;  %3085 = vmatprep.mubr.f32.mxu0 %v3871_v22 }
 0x596   :  { %3086 = vmatmul.mubr.f32.gmra.mrb[6].mxu0 %v3873_v13 }
 0x597   :  { %3120 = vmatprep.mubr.f32.mxu0 %v3867_v31 }
 0x59a   :  { %3121 = vmatmul.mubr.f32.vlgmr.msra.gmra.mrb[8].mxu0 %v3869_v18 }
 0x59b   :  { %3123 = vmatprep.mubr.f32.mxu0 %v3871_v22 }
 0x59e   :  { %3124 = vmatmul.mubr.f32.gmra.mrb[10].mxu0 %v3873_v13 }
 0x634   :  { %v3084_v49 = vpop.f32.mrb[4].mxu0 }
 0x635   :  { %v740_v2 = vpop.f32.mrb[5].mxu0  ;;  %3874 = vrcp.f32 %v3084_v49 }
 0x636   :  { %3876 = vrcp.f32 %v740_v2 }
 0x63f   :  { %v3875_v18 = vpop.eup %3874 }
 0x640   :  { %v3877_v44 = vpop.eup %3876 }
 0x669   :  { %v3087_v3 = vpop.f32.mrb[6].mxu0 }
 0x66a   :  { %3878 = vrcp.f32 %v3087_v3  ;;  %v750_v31 = vpop.f32.mrb[7].mxu0 }
 0x66b   :  { %3880 = vrcp.f32 %v750_v31 }
 0x66d   :  { %v3122_v4 = vpop.f32.mrb[8].mxu0 }
 0x66e   :  { %v913_v33 = vmul.f32 %v3875_v18, %v3122_v4  ;;  %v889_v25 = vpop.f32.mrb[9].mxu0 }
 0x66f   :  { %v912_v21 = vmul.f32 %v3877_v44, %v889_v25 }
 0x671   :  { %v3125_v55 = vpop.f32.mrb[10].mxu0  ;;  %3134 = vmatprep.mubr.msk.f32.mxu1 %vm173_vm0, %v912_v21 }
 0x672   :  { %v899_v7 = vpop.f32.mrb[11].mxu0  ;;  %3135 = vmatmul.mubr.msk.f32.vlgmr.msra.gmra.mrb[8].mxu1 %vm173_vm0, %v913_v33 }
 0x674   :  { %v3879_v36 = vpop.eup %3878 }
 0x675   :  { %v3881_v24 = vpop.eup %3880  ;;  %v915_v56 = vmul.f32 %v3879_v36, %v3125_v55 }
 0x676   :  { %v914_v22 = vmul.f32 %v3881_v24, %v899_v7 }
 0x678   :  { %3137 = vmatprep.mubr.msk.f32.mxu1 %vm173_vm0, %v914_v22 }
 0x679   :  { %3138 = vmatmul.mubr.msk.f32.gmra.mrb[10].mxu1 %vm173_vm0, %v915_v56 }
 0x745   :  { %v3136_v13 = vpop.f32.mrb[8].mxu1 }
 0x746   :  { %v1018_v34 = vadd.f32 %v3136_v13, %v4077_v35  ;;  %v998_v38 = vpop.f32.mrb[9].mxu1 }
 0x747   :  { %v1017_v28 = vadd.f32 %v998_v38, %v4075_v32 }
 0x748   :  { %v4471_v6 = vadd.f32 %v2687_v15, %v1018_v34 }
 0x749   :  { %v4473_v12 = vadd.f32 %v2687_v15, %v1017_v28 }
 0x74a   :  { %v1033_v49 = vsel %vm173_vm0, %v4471_v6, 0.0 }
 0x74b   :  { %1034 = vadd.xlane.f32.xlu1 %v1033_v49  ;;  %v1030_v2 = vsel %vm173_vm0, %v4473_v12, 0.0 }
 0x74c   :  { %1031 = vadd.xlane.f32.xlu0 %v1030_v2  ;;  %v3139_v3 = vpop.f32.mrb[10].mxu1 }
 0x74d   :  { %v1008_v31 = vpop.f32.mrb[11].mxu1  ;;  %v1020_v18 = vadd.f32 %v3139_v3, %v4081_v39 }
 0x74e   :  { %v1019_v35 = vadd.f32 %v1008_v31, %v4083_v40 }
 0x74f   :  { %v4483_v32 = vadd.f32 %v2687_v15, %v1020_v18 }
 0x750   :  { %v4481_v4 = vadd.f32 %v2687_v15, %v1019_v35  ;;  %v1082_v35 = vld [vmem:[#allocation5 + $0x190] sm:$0xff] }
 0x751   :  { %v1039_v33 = vsel %vm173_vm0, %v4483_v32, 0.0 }
 0x752   :  { %v1036_v44 = vsel %vm173_vm0, %v4481_v4, 0.0 }
 0x753   :  { %1037 = vadd.xlane.f32.xlu0 %v1036_v44  ;;  %v1083_v44 = vld [vmem:[#allocation5 + $0x198] sm:$0xff] }
 0x757   :  { %1040 = vadd.xlane.f32.xlu0 %v1039_v33  ;;  %v3514_v33 = vpack.c.bf16 %v1083_v44, %v1082_v35 }
 0x759   :  { %3515 = vmatprep.subr.bf16.mxu1 %v3514_v33 }
 0x75a   :  { %3517 = vmatpush3.bf16.msra.mxu1 %v3514_v33 }
 0x7d8   :  { %v1035_v25 = vpop.xlane.xlu1 %1034 }
 0x7d9   :  { %v1043_v21 = vmul.f32 0.03125, %v1035_v25  ;;  %v1032_v55 = vpop.xlane.xlu0 %1031  ;;  %v1084_v25 = vld [vmem:[#allocation5 + $0x1a0] sm:$0xff] }
 0x7da   :  { %v1042_v7 = vmul.f32 0.03125, %v1032_v55 }
 0x7db   :  { %v1047_v39 = vsub.f32 %v4471_v6, %v1043_v21  ;;  %v1085_v21 = vld [vmem:[#allocation5 + $0x1a8] sm:$0xff] }
 0x7dc   :  { %v1046_v40 = vsub.f32 %v4473_v12, %v1042_v7  ;;  %v3518_v55 = vpack.c.bf16 %v1085_v21, %v1084_v25 }
 0x7dd   :  { %v1051_v36 = vmul.f32 %v1047_v39, %v1047_v39 }
 0x7de   :  { %v1050_v24 = vmul.f32 %v1046_v40, %v1046_v40  ;;  %3519 = vmatprep.subr.bf16.mxu1 %v3518_v55 }
 0x7df   :  { %v1057_v56 = vsel %vm173_vm0, %v1051_v36, 0.0  ;;  %3521 = vmatpush3.bf16.msra.mxu1 %v3518_v55 }
 0x7e0   :  { %1058 = vadd.xlane.f32.xlu1 %v1057_v56  ;;  %v1038_v22 = vpop.xlane.xlu0 %1037  ;;  %v1054_v13 = vsel %vm173_vm0, %v1050_v24, 0.0 }
 0x7e1   :  { %v1044_v15 = vmul.f32 0.03125, %v1038_v22  ;;  %1055 = vadd.xlane.f32.xlu0 %v1054_v13 }
 0x7e3   :  { %v1048_v34 = vsub.f32 %v4481_v4, %v1044_v15 }
 0x7e4   :  { %v1041_v38 = vpop.xlane.xlu0 %1040 }
 0x7e5   :  { %v1045_v28 = vmul.f32 0.03125, %v1041_v38  ;;  %v1052_v49 = vmul.f32 %v1048_v34, %v1048_v34 }
 0x7e7   :  { %v1049_v2 = vsub.f32 %v4483_v32, %v1045_v28  ;;  %v1060_v3 = vsel %vm173_vm0, %v1052_v49, 0.0 }
 0x7e8   :  { %1061 = vadd.xlane.f32.xlu0 %v1060_v3 }
 0x7e9   :  { %v1053_v31 = vmul.f32 %v1049_v2, %v1049_v2 }
 0x7eb   :  { %v1063_v18 = vsel %vm173_vm0, %v1053_v31, 0.0 }
 0x7ec   :  { %1064 = vadd.xlane.f32.xlu1 %v1063_v18 }
 0x86d   :  { %v1059_v7 = vpop.xlane.xlu1 %1058 }
 0x86e   :  { %v1067_v36 = vmul.f32 0.03125, %v1059_v7  ;;  %v1056_v24 = vpop.xlane.xlu0 %1055 }
 0x86f   :  { %v1066_v56 = vmul.f32 0.03125, %v1056_v24  ;;  %v1309_v24 = vld [vmem:[#allocation5 + $0x1c0] sm:$0xff] }
 0x870   :  { %v1071_v22 = vadd.f32 1e-06, %v1067_v36  ;;  %v1308_v36 = vld [vmem:[#allocation5 + $0x1b8] sm:$0xff] }
 0x871   :  { %v1070_v13 = vadd.f32 1e-06, %v1066_v56  ;;  %v3522_v56 = vpack.c.bf16 %v1309_v24, %v1308_v36 }
 0x872   :  { %3882 = vrsqrt.f32 %v1071_v22  ;;  %v1310_v22 = vld [vmem:[#allocation5 + $0x1c8] sm:$0xff] }
 0x873   :  { %3884 = vrsqrt.f32 %v1070_v13  ;;  %3523 = vmatprep.subr.bf16.mxu1 %v3522_v56  ;;  %v1312_v13 = vld [vmem:[#allocation5 + $0x1d8] sm:$0xff] }
 0x875   :  { %v1062_v15 = vpop.xlane.xlu0 %1061 }
 0x876   :  { %v1068_v38 = vmul.f32 0.03125, %v1062_v15  ;;  %v1313_v15 = vld [vmem:[#allocation5 + $0x1e0] sm:$0xff] }
 0x878   :  { %v1072_v28 = vadd.f32 1e-06, %v1068_v38  ;;  %v3530_v38 = vpack.c.bf16 %v1313_v15, %v1312_v13 }
 0x879   :  { %v1065_v49 = vpop.xlane.xlu1 %1064 }
 0x87a   :  { %3886 = vrsqrt.f32 %v1072_v28  ;;  %v1069_v3 = vmul.f32 0.03125, %v1065_v49  ;;  %v1315_v28 = vld [vmem:[#allocation5 + $0x1f0] sm:$0xff] }
 0x87b   :  { %v2688_v49 = vld [vmem:[#allocation5 + $0x1b0] ss:$0 sm:$0xff] }
 0x87c   :  { %v3883_v31 = vpop.eup %3882  ;;  %v1073_v18 = vadd.f32 1e-06, %v1069_v3 }
 0x87d   :  { %v3885_v35 = vpop.eup %3884  ;;  %v1079_v33 = vmul.f32 %v3883_v31, %v1047_v39 }
 0x87e   :  { %3888 = vrsqrt.f32 %v1073_v18  ;;  %v1078_v44 = vmul.f32 %v3885_v35, %v1046_v40  ;;  %v1311_v40 = vld [vmem:[#allocation5 + $0x1d0] sm:$0xff] }
 0x87f   :  { %v3526_v39 = vpack.c.bf16 %v1311_v40, %v1310_v22 }
 0x880   :  { %3148 = vmatprep.mubr.msk.f32.mxu1 %vm173_vm0, %v1078_v44 }
 0x881   :  { %3149 = vmatmul.mubr.msk.f32.vlgmr.msra.gmra.mrb[12].mxu1 %vm173_vm0, %v1079_v33 }
 0x882   :  { %3525 = vmatpush3.bf16.msra.mxu1 %v3522_v56 }
 0x883   :  { %3527 = vmatprep.subr.bf16.mxu1 %v3526_v39 }
 0x884   :  { %v3887_v25 = vpop.eup %3886 }
 0x885   :  { %v1080_v21 = vmul.f32 %v3887_v25, %v1048_v34  ;;  %v1314_v34 = vld [vmem:[#allocation5 + $0x1e8] sm:$0xff] }
 0x886   :  { %3529 = vmatpush3.bf16.msra.mxu1 %v3526_v39 }
 0x887   :  { %3151 = vmatprep.mubr.msk.f32.mxu1 %vm173_vm0, %v1080_v21  ;;  %3531 = vmatprep.subr.bf16.mxu1 %v3530_v38 }
 0x888   :  { %v3889_v55 = vpop.eup %3888 }
 0x889   :  { %v1081_v7 = vmul.f32 %v3889_v55, %v1049_v2  ;;  %v3534_v2 = vpack.c.bf16 %v1315_v28, %v1314_v34 }
 0x88a   :  { %3533 = vmatpush3.bf16.msra.mxu1 %v3530_v38 }
 0x88b   :  { %3152 = vmatmul.mubr.msk.f32.gmra.mrb[14].mxu1 %vm173_vm0, %v1081_v7  ;;  %3535 = vmatprep.subr.bf16.mxu1 %v3534_v2 }
 0x88e   :  { %3537 = vmatpush3.bf16.msra.mxu1 %v3534_v2 }
 0x954   :  { %v3150_v3 = vpop.f32.mrb[12].mxu1 }
 0x955   :  { %v4501_v31 = vadd.f32 %v3150_v3, %v2688_v49  ;;  %v1169_v18 = vpop.f32.mrb[13].mxu1 }
 0x956   :  { %v4503_v35 = vadd.f32 %v2688_v49, %v1169_v18 }
 0x957   :  { %v1193_v44 = vmul.f32 0.70710677, %v4501_v31 }
 0x958   :  { %v1192_v33 = vmul.f32 0.70710677, %v4503_v35 }
 0x959   :  { %v4507_v25 = vclamps-f32 %v1193_v44, 4.0 }
 0x95a   :  { %v4509_v21 = vclamps-f32 %v1192_v33, 4.0 }
 0x95b   :  { %v4513_v55 = vmul.f32 %v4507_v25, %v4507_v25 }
 0x95c   :  { %v4517_v7 = vmul.f32 %v4509_v21, %v4509_v21 }
 0x95d   :  { %v1209_v36 = vmul.f32 -2.7261424e-10, %v4513_v55  ;;  %v1257_v24 = vmul.f32 -1.45660715e-05, %v4513_v55 }
 0x95e   :  { %v1208_v56 = vmul.f32 -2.7261424e-10, %v4517_v7  ;;  %v1256_v22 = vmul.f32 -1.45660715e-05, %v4517_v7  ;;  %v3153_v40 = vpop.f32.mrb[14].mxu1 }
 0x95f   :  { %v1213_v39 = vadd.f32 2.7706815e-08, %v1209_v36  ;;  %v1261_v13 = vadd.f32 -0.00021337405, %v1257_v24  ;;  %v4523_v15 = vadd.f32 %v3153_v40, %v2688_v49  ;;  %v1179_v38 = vpop.f32.mrb[15].mxu1 }
 0x960   :  { %v1212_v34 = vadd.f32 2.7706815e-08, %v1208_v56  ;;  %v1260_v28 = vadd.f32 -0.00021337405, %v1256_v22  ;;  %v4525_v2 = vadd.f32 %v2688_v49, %v1179_v38 }
 0x961   :  { %v1217_v3 = vmul.f32 %v1213_v39, %v4513_v55  ;;  %v1265_v18 = vmul.f32 %v1261_v13, %v4513_v55  ;;  %v1195_v44 = vmul.f32 0.70710677, %v4523_v15 }
 0x962   :  { %v1216_v33 = vmul.f32 %v1212_v34, %v4517_v7  ;;  %v1264_v45 = vmul.f32 %v1260_v28, %v4517_v7  ;;  %v1194_v36 = vmul.f32 0.70710677, %v4525_v2 }
 0x963   :  { %v1221_v24 = vadd.f32 -2.101024e-06, %v1217_v3  ;;  %v1269_v40 = vadd.f32 -0.001682827, %v1265_v18  ;;  %v4533_v54 = vclamps-f32 %v1195_v44, 4.0 }
 0x964   :  { %v1220_v56 = vadd.f32 -2.101024e-06, %v1216_v33  ;;  %v1268_v22 = vadd.f32 -0.001682827, %v1264_v45  ;;  %v4535_v49 = vclamps-f32 %v1194_v36, 4.0 }
 0x965   :  { %v1225_v39 = vmul.f32 %v1221_v24, %v4513_v55  ;;  %v1273_v13 = vmul.f32 %v1269_v40, %v4513_v55  ;;  %v4541_v38 = vmul.f32 %v4533_v54, %v4533_v54 }
 0x966   :  { %v1224_v34 = vmul.f32 %v1220_v56, %v4517_v7  ;;  %v1272_v28 = vmul.f32 %v1268_v22, %v4517_v7  ;;  %v4547_v3 = vmul.f32 %v4535_v49, %v4535_v49 }
 0x967   :  { %v1229_v18 = vadd.f32 -5.6925062e-05, %v1225_v39  ;;  %v1277_v45 = vadd.f32 -0.0073733293, %v1273_v13  ;;  %v1211_v44 = vmul.f32 -2.7261424e-10, %v4541_v38 }
 0x968   :  { %v1228_v33 = vadd.f32 -5.6925062e-05, %v1224_v34  ;;  %v1276_v36 = vadd.f32 -0.0073733293, %v1272_v28  ;;  %v1259_v24 = vmul.f32 -1.45660715e-05, %v4541_v38 }
 0x969   :  { %v1233_v40 = vmul.f32 %v1229_v18, %v4513_v55  ;;  %v1281_v50 = vmul.f32 %v1277_v45, %v4513_v55  ;;  %v1215_v27 = vadd.f32 2.7706815e-08, %v1211_v44  ;;  %v1210_v56 = vmul.f32 -2.7261424e-10, %v4547_v3 }
 0x96a   :  { %v1232_v22 = vmul.f32 %v1228_v33, %v4517_v7  ;;  %v1280_v19 = vmul.f32 %v1276_v36, %v4517_v7  ;;  %v1263_v16 = vadd.f32 -0.00021337405, %v1259_v24  ;;  %v1258_v39 = vmul.f32 -1.45660715e-05, %v4547_v3 }
 0x96b   :  { %v1237_v13 = vadd.f32 -0.00073499064, %v1233_v40  ;;  %v1285_v8 = vadd.f32 -0.014264739, %v1281_v50  ;;  %v1219_v34 = vmul.f32 %v1215_v27, %v4541_v38  ;;  %v1214_v28 = vadd.f32 2.7706815e-08, %v1210_v56 }
 0x96c   :  { %v1236_v42 = vadd.f32 -0.00073499064, %v1232_v22  ;;  %v1284_v9 = vadd.f32 -0.014264739, %v1280_v19  ;;  %v1267_v18 = vmul.f32 %v1263_v16, %v4541_v38  ;;  %v1262_v45 = vadd.f32 -0.00021337405, %v1258_v39 }
 0x96d   :  { %v1241_v44 = vmul.f32 %v1237_v13, %v4513_v55  ;;  %3890 = vrcp.f32 %v1285_v8  ;;  %v1223_v43 = vadd.f32 -2.101024e-06, %v1219_v34  ;;  %v1218_v33 = vmul.f32 %v1214_v28, %v4547_v3 }
 0x96e   :  { %v1240_v36 = vmul.f32 %v1236_v42, %v4517_v7  ;;  %3892 = vrcp.f32 %v1284_v9  ;;  %v1271_v24 = vadd.f32 -0.001682827, %v1267_v18  ;;  %v1266_v50 = vmul.f32 %v1262_v45, %v4547_v3 }
 0x96f   :  { %v1245_v40 = vadd.f32 -0.0029546, %v1241_v44  ;;  %v1227_v27 = vmul.f32 %v1223_v43, %v4541_v38  ;;  %v1222_v56 = vadd.f32 -2.101024e-06, %v1218_v33 }
 0x970   :  { %v1244_v19 = vadd.f32 -0.0029546, %v1240_v36  ;;  %v1275_v16 = vmul.f32 %v1271_v24, %v4541_v38  ;;  %v1270_v22 = vadd.f32 -0.001682827, %v1266_v50 }
 0x971   :  { %v1249_v39 = vmul.f32 %v1245_v40, %v4513_v55  ;;  %v1231_v8 = vadd.f32 -5.6925062e-05, %v1227_v27  ;;  %v1226_v13 = vmul.f32 %v1222_v56, %v4547_v3 }
 0x972   :  { %v1248_v34 = vmul.f32 %v1244_v19, %v4517_v7  ;;  %v1279_v42 = vadd.f32 -0.0073733293, %v1275_v16  ;;  %v1274_v9 = vmul.f32 %v1270_v22, %v4547_v3 }
 0x973   :  { %v1253_v28 = vadd.f32 -0.016096033, %v1249_v39  ;;  %v1235_v18 = vmul.f32 %v1231_v8, %v4541_v38  ;;  %v1230_v45 = vadd.f32 -5.6925062e-05, %v1226_v13 }
 0x974   :  { %v1252_v43 = vadd.f32 -0.016096033, %v1248_v34  ;;  %v1283_v44 = vmul.f32 %v1279_v42, %v4541_v38  ;;  %v1278_v33 = vadd.f32 -0.0073733293, %v1274_v9  ;;  %v1188_v42 = vmul.f32 0.5, %v4503_v35 }
 0x975   :  { %v1289_v36 = vmul.f32 %v4507_v25, %v1253_v28  ;;  %v1239_v24 = vadd.f32 -0.00073499064, %v1235_v18  ;;  %v1234_v55 = vmul.f32 %v1230_v45, %v4547_v3  ;;  %v1189_v18 = vmul.f32 0.5, %v4501_v31 }
 0x976   :  { %v1288_v50 = vmul.f32 %v4509_v21, %v1252_v43  ;;  %v1287_v40 = vadd.f32 -0.014264739, %v1283_v44  ;;  %v1282_v7 = vmul.f32 %v1278_v33, %v4547_v3 }
 0x977   :  { %v3891_v27 = vpop.eup %3890  ;;  %v1243_v56 = vmul.f32 %v1239_v24, %v4541_v38  ;;  %v1238_v19 = vadd.f32 -0.00073499064, %v1234_v55 }
 0x978   :  { %v3893_v16 = vpop.eup %3892  ;;  %v1297_v22 = vmul.f32 %v3891_v27, %v1289_v36  ;;  %3894 = vrcp.f32 %v1287_v40  ;;  %v1286_v39 = vadd.f32 -0.014264739, %v1282_v7  ;;  %v1190_v7 = vmul.f32 0.5, %v4525_v2 }
 0x979   :  { %v1296_v8 = vmul.f32 %v3893_v16, %v1288_v50  ;;  %v1247_v13 = vadd.f32 -0.0029546, %v1243_v56  ;;  %v1242_v25 = vmul.f32 %v1238_v19, %v4547_v3  ;;  %v2701_v16 = vld [vmem:[#allocation5 + $0x1f8] ss:$0 sm:$0xff] }
 0x97a   :  { %v1301_v34 = vadd.f32 1.0, %v1297_v22  ;;  %3896 = vrcp.f32 %v1286_v39 }
 0x97b   :  { %v1300_v21 = vadd.f32 1.0, %v1296_v8  ;;  %v1251_v9 = vmul.f32 %v1247_v13, %v4541_v38  ;;  %v1246_v28 = vadd.f32 -0.0029546, %v1242_v25 }
 0x97c   :  { %v1305_v33 = vmul.f32 %v1301_v34, %v1189_v18 }
 0x97d   :  { %v1304_v45 = vmul.f32 %v1300_v21, %v1188_v42  ;;  %v1255_v43 = vadd.f32 -0.016096033, %v1251_v9  ;;  %v1250_v44 = vmul.f32 %v1246_v28, %v4547_v3  ;;  %v1191_v3 = vmul.f32 0.5, %v4523_v15 }
 0x97f   :  { %v1291_v36 = vmul.f32 %v4533_v54, %v1255_v43  ;;  %v1254_v24 = vadd.f32 -0.016096033, %v1250_v44  ;;  %3170 = vmatprep.mubr.msk.f32.mxu1 %vm1316_vm2, %v1304_v45 }
 0x980   :  { %3171 = vmatmul.mubr.msk.f32.vlgmr.msra.gmra.mrb[16].mxu1 %vm1316_vm2, %v1305_v33 }
 0x981   :  { %v1290_v35 = vmul.f32 %v4535_v49, %v1254_v24 }
 0x982   :  { %v3895_v55 = vpop.eup %3894 }
 0x983   :  { %v1299_v38 = vmul.f32 %v3895_v55, %v1291_v36 }
 0x984   :  { %v3897_v50 = vpop.eup %3896 }
 0x985   :  { %v1298_v40 = vmul.f32 %v3897_v50, %v1290_v35  ;;  %v1303_v31 = vadd.f32 1.0, %v1299_v38 }
 0x987   :  { %v1302_v27 = vadd.f32 1.0, %v1298_v40  ;;  %v1307_v19 = vmul.f32 %v1303_v31, %v1191_v3 }
 0x989   :  { %v1306_v56 = vmul.f32 %v1302_v27, %v1190_v7 }
 0x98b   :  { %3173 = vmatprep.mubr.msk.f32.mxu1 %vm1316_vm2, %v1306_v56 }
 0x98c   :  { %3174 = vmatmul.mubr.msk.f32.gmra.mrb[18].mxu1 %vm1316_vm2, %v1307_v19 }
 0xa53   :  { %v3172_v54 = vpop.f32.mrb[16].mxu1 }
 0xa54   :  { %v1415_v49 = vadd.f32 %v3172_v54, %v4471_v6  ;;  %v1395_v22 = vpop.f32.mrb[17].mxu1  ;;  %v1479_v54 = vld [vmem:[#allocation5 + $0x200] sm:$0xff] }
 0xa55   :  { %v1414_v39 = vadd.f32 %v1395_v22, %v4473_v12  ;;  %v1481_v22 = vld [vmem:[#allocation5 + $0x210] sm:$0xff] }
 0xa56   :  { %v4591_v8 = vadd.f32 %v2701_v16, %v1415_v49 }
 0xa57   :  { %v4593_v13 = vadd.f32 %v2701_v16, %v1414_v39  ;;  %v1482_v39 = vld [vmem:[#allocation5 + $0x218] sm:$0xff] }
 0xa58   :  { %v1430_v15 = vsel %vm173_vm0, %v4591_v8, 0.0 }
 0xa59   :  { %1431 = vadd.xlane.f32.xlu1 %v1430_v15  ;;  %v1427_v2 = vsel %vm173_vm0, %v4593_v13, 0.0  ;;  %v3542_v15 = vpack.c.bf16 %v1482_v39, %v1481_v22 }
 0xa5a   :  { %1428 = vadd.xlane.f32.xlu0 %v1427_v2 }
 0xa5f   :  { %v3175_v25 = vpop.f32.mrb[18].mxu1 }
 0xa60   :  { %v1417_v34 = vadd.f32 %v3175_v25, %v4483_v32  ;;  %v1405_v42 = vpop.f32.mrb[19].mxu1 }
 0xa61   :  { %v1416_v6 = vadd.f32 %v1405_v42, %v4481_v4 }
 0xa62   :  { %v4601_v21 = vadd.f32 %v2701_v16, %v1417_v34 }
 0xa63   :  { %v4603_v12 = vadd.f32 %v2701_v16, %v1416_v6  ;;  %v1480_v16 = vld [vmem:[#allocation5 + $0x208] sm:$0xff] }
 0xa64   :  { %v1436_v9 = vsel %vm173_vm0, %v4601_v21, 0.0  ;;  %v3538_v49 = vpack.c.bf16 %v1480_v16, %v1479_v54 }
 0xa65   :  { %1437 = vadd.xlane.f32.xlu1 %v1436_v9  ;;  %v1433_v28 = vsel %vm173_vm0, %v4603_v12, 0.0 }
 0xa66   :  { %1434 = vadd.xlane.f32.xlu0 %v1433_v28  ;;  %3539 = vmatprep.subr.bf16.mxu1 %v3538_v49 }
 0xa67   :  { %3541 = vmatpush3.bf16.msra.mxu1 %v3538_v49 }
 0xa68   :  { %3543 = vmatprep.subr.bf16.mxu1 %v3542_v15 }
 0xa6b   :  { %3545 = vmatpush3.bf16.msra.mxu1 %v3542_v15 }
 0xa6c   :  { %3595 = vmatprep.subr.bf16.mxu1 %v4131_v11 }
 0xae6   :  { %v1432_v18 = vpop.xlane.xlu1 %1431 }
 0xae7   :  { %v1440_v45 = vmul.f32 0.03125, %v1432_v18  ;;  %v1429_v43 = vpop.xlane.xlu0 %1428 }
 0xae8   :  { %v1439_v44 = vmul.f32 0.03125, %v1429_v43 }
 0xae9   :  { %v1444_v32 = vsub.f32 %v4591_v8, %v1440_v45 }
 0xaea   :  { %v1443_v4 = vsub.f32 %v4593_v13, %v1439_v44 }
 0xaeb   :  { %v1448_v33 = vmul.f32 %v1444_v32, %v1444_v32 }
 0xaec   :  { %v1447_v36 = vmul.f32 %v1443_v4, %v1443_v4 }
 0xaed   :  { %v1454_v24 = vsel %vm173_vm0, %v1448_v33, 0.0 }
 0xaee   :  { %1455 = vadd.xlane.f32.xlu1 %v1454_v24  ;;  %v1451_v35 = vsel %vm173_vm0, %v1447_v36, 0.0 }
 0xaef   :  { %1452 = vadd.xlane.f32.xlu0 %v1451_v35 }
 0xaf2   :  { %v1438_v55 = vpop.xlane.xlu1 %1437 }
 0xaf3   :  { %v1442_v38 = vmul.f32 0.03125, %v1438_v55  ;;  %v1435_v50 = vpop.xlane.xlu0 %1434 }
 0xaf4   :  { %v1441_v40 = vmul.f32 0.03125, %v1435_v50 }
 0xaf5   :  { %v1446_v31 = vsub.f32 %v4601_v21, %v1442_v38 }
 0xaf6   :  { %v1445_v7 = vsub.f32 %v4603_v12, %v1441_v40 }
 0xaf7   :  { %v1450_v27 = vmul.f32 %v1446_v31, %v1446_v31 }
 0xaf8   :  { %v1449_v3 = vmul.f32 %v1445_v7, %v1445_v7 }
 0xaf9   :  { %v1460_v56 = vsel %vm173_vm0, %v1450_v27, 0.0 }
 0xafa   :  { %1461 = vadd.xlane.f32.xlu1 %v1460_v56  ;;  %v1457_v19 = vsel %vm173_vm0, %v1449_v3, 0.0 }
 0xafb   :  { %1458 = vadd.xlane.f32.xlu0 %v1457_v19 }
 0xb7b   :  { %v1456_v2 = vpop.xlane.xlu1 %1455 }
 0xb7c   :  { %v1464_v25 = vmul.f32 0.03125, %v1456_v2  ;;  %v1453_v34 = vpop.xlane.xlu0 %1452 }
 0xb7d   :  { %v1463_v42 = vmul.f32 0.03125, %v1453_v34  ;;  %v4958_v34 = vld [vmem:[#allocation13_spill] sm:$0xff] }
 0xb7e   :  { %v1468_v6 = vadd.f32 1e-06, %v1464_v25 }
 0xb7f   :  { %v1467_v9 = vadd.f32 1e-06, %v1463_v42 }
 0xb80   :  { %3898 = vrsqrt.f32 %v1468_v6 }
 0xb81   :  { %3900 = vrsqrt.f32 %v1467_v9 }
 0xb87   :  { %v1462_v28 = vpop.xlane.xlu1 %1461 }
 0xb88   :  { %v1466_v18 = vmul.f32 0.03125, %v1462_v28  ;;  %v1459_v45 = vpop.xlane.xlu0 %1458 }
 0xb89   :  { %v1465_v43 = vmul.f32 0.03125, %v1459_v45 }
 0xb8a   :  { %v3899_v44 = vpop.eup %3898  ;;  %v1470_v33 = vadd.f32 1e-06, %v1466_v18 }
 0xb8b   :  { %v3901_v36 = vpop.eup %3900  ;;  %v1469_v24 = vadd.f32 1e-06, %v1465_v43  ;;  %v1476_v55 = vmul.f32 %v3899_v44, %v1444_v32 }
 0xb8c   :  { %3902 = vrsqrt.f32 %v1470_v33  ;;  %v1475_v35 = vmul.f32 %v3901_v36, %v1443_v4 }
 0xb8d   :  { %3904 = vrsqrt.f32 %v1469_v24 }
 0xb8e   :  { %3184 = vmatprep.mubr.msk.f32.mxu1 %vm173_vm0, %v1475_v35 }
 0xb8f   :  { %3185 = vmatmul.mubr.msk.f32.vlgmr.msra.gmra.mrb[20].mxu1 %vm173_vm0, %v1476_v55 }
 0xb90   :  { %3597 = vmatpush3.bf16.msra.mxu1 %v4131_v11 }
 0xb91   :  { %3599 = vmatprep.subr.bf16.mxu1 %v4127_v10 }
 0xb94   :  { %3601 = vmatpush3.bf16.msra.mxu1 %v4127_v10  ;;  %v2702_v10 = vld [vmem:[#allocation5 + $0x220] ss:$0 sm:$0xff] }
 0xb95   :  { %3603 = vmatprep.subr.bf16.mxu1 %v4145_v14 }
 0xb96   :  { %v3903_v38 = vpop.eup %3902 }
 0xb97   :  { %v3905_v50 = vpop.eup %3904  ;;  %v1478_v4 = vmul.f32 %v3903_v38, %v1446_v31 }
 0xb98   :  { %v1477_v40 = vmul.f32 %v3905_v50, %v1445_v7  ;;  %3605 = vmatpush3.bf16.msra.mxu1 %v4145_v14 }
 0xb99   :  { %3607 = vmatprep.subr.bf16.mxu1 %v4159_v17 }
 0xb9a   :  { %3187 = vmatprep.mubr.msk.f32.mxu1 %vm173_vm0, %v1477_v40 }
 0xb9b   :  { %3188 = vmatmul.mubr.msk.f32.gmra.mrb[22].mxu1 %vm173_vm0, %v1478_v4 }
 0xb9c   :  { %3609 = vmatpush3.bf16.msra.mxu1 %v4159_v17 }
 0xb9d   :  { %3611 = vmatprep.subr.bf16.mxu1 %v4173_v20 }
 0xba0   :  { %3613 = vmatpush3.bf16.msra.mxu1 %v4173_v20 }
 0xba1   :  { %3615 = vmatprep.subr.bf16.mxu1 %v4187_v23 }
 0xba4   :  { %3617 = vmatpush3.bf16.msra.mxu1 %v4187_v23 }
 0xba5   :  { %3619 = vmatprep.subr.bf16.mxu1 %v4201_v26 }
 0xba8   :  { %3621 = vmatpush3.bf16.msra.mxu1 %v4201_v26 }
 0xba9   :  { %3623 = vmatprep.subr.bf16.mxu1 %v4215_v29 }
 0xbac   :  { %3625 = vmatpush3.bf16.msra.mxu1 %v4215_v29 }
 0xc62   :  { %v3186_v11 = vpop.f32.mrb[20].mxu1 }
 0xc63   :  { %v4637_v14 = vadd.f32 %v3186_v11, %v2702_v10  ;;  %v1566_v17 = vpop.f32.mrb[21].mxu1 }
 0xc64   :  { %v4639_v32 = vadd.f32 %v2702_v10, %v1566_v17 }
 0xc65   :  { %v1586_v20 = vmul.f32 %v4637_v14, %v4235_v57  ;;  %v1594_v31 = vmul.f32 %v4637_v14, %v4251_v63  ;;  %v1598_v57 = vmul.f32 %v4637_v14, %v4282_v47  ;;  %v1602_v54 = vmul.f32 %v4637_v14, %v4369_v1 }
 0xc66   :  { %3222 = vmatprep.mubr.msk.f32.mxu0 %vm173_vm0, %v4639_v32  ;;  %v1585_v23 = vmul.f32 %v4639_v32, %v4241_v60  ;;  %v1593_v29 = vmul.f32 %v4639_v32, %v4253_v59  ;;  %v1597_v27 = vmul.f32 %v4639_v32, %v4284_v48  ;;  %v1601_v63 = vmul.f32 %v4639_v32, %v4365_v51 }
 0xc67   :  { %v1589_v22 = vmul.f32 %v4639_v32, %v4245_v52  ;;  %v1590_v39 = vmul.f32 %v4637_v14, %v4243_v53 }
 0xc68   :  { %v3778_v26 = vpack.i.bf16 %v1586_v20, %v1585_v23  ;;  %v3798_v7 = vpack.i.bf16 %v1594_v31, %v1593_v29  ;;  %v3808_v59 = vpack.i.bf16 %v1598_v57, %v1597_v27  ;;  %v3818_v49 = vpack.i.bf16 %v1602_v54, %v1601_v63 }
 0xc69   :  { %v3788_v51 = vpack.i.bf16 %v1590_v39, %v1589_v22  ;;  %v3947_v39 = vld [vmem:[#allocation5 + $0xa0] sm:$0xff] }
 0xc6a   :  { %3779 = vrot.lane.b32.xlu0 %v3778_v26, %s4027_s6 }
 0xc6e   :  { %v3189_v3 = vpop.f32.mrb[22].mxu1  ;;  %3799 = vrot.lane.b32.xlu0 %v3798_v7, %s4027_s6 }
 0xc6f   :  { %v4657_v60 = vadd.f32 %v3189_v3, %v2702_v10  ;;  %v1576_v56 = vpop.f32.mrb[23].mxu1 }
 0xc70   :  { %v4659_v19 = vadd.f32 %v2702_v10, %v1576_v56 }
 0xc71   :  { %v1588_v48 = vmul.f32 %v4657_v60, %v4239_v58  ;;  %v1592_v1 = vmul.f32 %v4657_v60, %v4247_v61  ;;  %v1596_v53 = vmul.f32 %v4657_v60, %v4259_v5 }
 0xc72   :  { %3809 = vrot.lane.b32.xlu0 %v3808_v59, %s4027_s6  ;;  %v1587_v47 = vmul.f32 %v4659_v19, %v4237_v46  ;;  %v1591_v58 = vmul.f32 %v4659_v19, %v4249_v62  ;;  %v1595_v52 = vmul.f32 %v4659_v19, %v4261_v30  ;;  %v1599_v2 = vmul.f32 %v4659_v19, %v4306_v41 }
 0xc73   :  { %v1600_v62 = vmul.f32 %v4657_v60, %v4304_v37  ;;  %v1603_v25 = vmul.f32 %v4659_v19, %v4367_v0  ;;  %v1604_v30 = vmul.f32 %v4657_v60, %v4958_v34  ;;  %v4967_v37 = vld [vmem:[#allocation22_spill] sm:$0xff] }
 0xc74   :  { %v3783_v16 = vpack.i.bf16 %v1588_v48, %v1587_v47  ;;  %v3793_v46 = vpack.i.bf16 %v1592_v1, %v1591_v58  ;;  %v3803_v15 = vpack.i.bf16 %v1596_v53, %v1595_v52  ;;  %v4961_v53 = vld [vmem:[#allocation14_spill] sm:$0xff] }
 0xc75   :  { %v3813_v61 = vpack.i.bf16 %v1600_v62, %v1599_v2  ;;  %v3823_v5 = vpack.i.bf16 %v1604_v30, %v1603_v25  ;;  %v4962_v62 = vld [vmem:[#allocation15_spill] sm:$0xff]  ;;  %v4963_v25 = vld [vmem:[#allocation16_spill] sm:$0xff]  ;;  %v4964_v30 = vld [vmem:[#allocation17_spill] sm:$0xff] }
 0xc76   :  { %3784 = vrot.lane.b32.xlu1 %v3783_v16, %s4027_s6  ;;  %3819 = vrot.lane.b32.xlu0 %v3818_v49, %s4028_s7  ;;  %v3946_v16 = vld [vmem:[#allocation5 + $0xa8] sm:$0xff]  ;;  %v1608_v34 = vmul.f32 %v4657_v60, %v4963_v25 }
 0xc7a   :  { %3789 = vrot.lane.b32.xlu1 %v3788_v51, %s4027_s6 }
 0xc7e   :  { %3794 = vrot.lane.b32.xlu1 %v3793_v46, %s4027_s6  ;;  %v4960_v46 = vld [vmem:[#allocation12_spill] sm:$0xff] }
 0xc7f   :  { %v1605_v52 = vmul.f32 %v4639_v32, %v4960_v46 }
 0xc82   :  { %3804 = vrot.lane.b32.xlu1 %v3803_v15, %s4027_s6  ;;  %v1606_v15 = vmul.f32 %v4637_v14, %v4961_v53 }
 0xc84   :  { %v3828_v2 = vpack.i.bf16 %v1606_v15, %v1605_v52 }
 0xc86   :  { %3814 = vrot.lane.b32.xlu1 %v3813_v61, %s4027_s6  ;;  %v1607_v61 = vmul.f32 %v4659_v19, %v4962_v62 }
 0xc8a   :  { %3824 = vrot.lane.b32.xlu1 %v3823_v5, %s4028_s7  ;;  %v1609_v5 = vmul.f32 %v4639_v32, %v4964_v30 }
 0xcdc   :  { %v3780_v42 = vpop.permute.xlu0 %3779 }
 0xcdd   :  { %v3782_v6 = vunpack.i.h.bf16 %v3780_v42  ;;  %v3781_v41 = vunpack.i.l.bf16 %v3780_v42  ;;  %v4965_v42 = vld [vmem:[#allocation21_spill] sm:$0xff] }
 0xcdf   :  { %v3546_v9 = vpack.c.bf16 %v3782_v6, %v3781_v41  ;;  %v1610_v6 = vmul.f32 %v4637_v14, %v4965_v42  ;;  %v3833_v41 = vpack.i.bf16 %v1608_v34, %v1607_v61 }
 0xce0   :  { %v3800_v28 = vpop.permute.xlu0 %3799 }
 0xce1   :  { %3548 = vmatprep.subr.msk.bf16.mxu0 %vm4351_vm1, %v3546_v9  ;;  %v3802_v20 = vunpack.i.h.bf16 %v3800_v28  ;;  %v3801_v23 = vunpack.i.l.bf16 %v3800_v28 }
 0xce2   :  { %3551 = vmatpush3.bf16.xpose.msk.msra.mxu0 %vm4351_vm1, %v3546_v9  ;;  %v4966_v9 = vld [vmem:[#allocation18_spill] sm:$0xff] }
 0xce3   :  { %v3570_v26 = vpack.c.bf16 %v3802_v20, %v3801_v23  ;;  %v1611_v28 = vmul.f32 %v4659_v19, %v4966_v9 }
 0xce4   :  { %v3810_v0 = vpop.permute.xlu0 %3809 }
 0xce5   :  { %v3812_v57 = vunpack.i.h.bf16 %v3810_v0  ;;  %v3811_v3 = vunpack.i.l.bf16 %v3810_v0  ;;  %v1612_v0 = vmul.f32 %v4657_v60, %v4967_v37 }
 0xce7   :  { %v3582_v56 = vpack.c.bf16 %v3812_v57, %v3811_v3 }
 0xce8   :  { %v3785_v18 = vpop.permute.xlu1 %3784  ;;  %v3820_v45 = vpop.permute.xlu0 %3819 }
 0xce9   :  { %v3787_v43 = vunpack.i.h.bf16 %v3785_v18  ;;  %v3786_v44 = vunpack.i.l.bf16 %v3785_v18  ;;  %v3822_v33 = vunpack.i.h.bf16 %v3820_v45  ;;  %v3821_v36 = vunpack.i.l.bf16 %v3820_v45 }
 0xcea   :  { %v3838_v18 = vpack.i.bf16 %v1610_v6, %v1609_v5  ;;  %v3843_v45 = vpack.i.bf16 %v1612_v0, %v1611_v28 }
 0xceb   :  { %v3552_v24 = vpack.c.bf16 %v3787_v43, %v3786_v44  ;;  %v4701_v35 = vpack.c.bf16 %v3822_v33, %v3821_v36  ;;  %v4968_v43 = vld [vmem:[#allocation20_spill] sm:$0xff] }
 0xcec   :  { %v3790_v55 = vpop.permute.xlu1 %3789  ;;  %v1615_v44 = vmul.f32 %v4659_v19, %v4968_v43  ;;  %v4969_v33 = vld [vmem:[#allocation24_spill] sm:$0xff] }
 0xced   :  { %v3792_v38 = vunpack.i.h.bf16 %v3790_v55  ;;  %v3791_v50 = vunpack.i.l.bf16 %v3790_v55  ;;  %3554 = vmatprep.subr.msk.bf16.mxu0 %vm4351_vm1, %v3552_v24  ;;  %3627 = vmatprep.subr.bf16.mxu1 %v4701_v35  ;;  %v1616_v36 = vmul.f32 %v4657_v60, %v4969_v33  ;;  %v3948_v55 = vld [vmem:[#allocation5 + $0xb8] sm:$0xff]  ;;  %v2059_v33 = vld [vmem:[#allocation5 + $0x240] sm:$0xff] }
 0xcee   :  { %3557 = vmatpush3.bf16.xpose.msk.msra.mxu0 %vm4351_vm1, %v3552_v24 }
 0xcef   :  { %v3558_v40 = vpack.c.bf16 %v3792_v38, %v3791_v50  ;;  %v3853_v24 = vpack.i.bf16 %v1616_v36, %v1615_v44  ;;  %v3949_v50 = vld [vmem:[#allocation5 + $0xb0] sm:$0xff]  ;;  %v2058_v44 = vld [vmem:[#allocation5 + $0x238] sm:$0xff] }
 0xcf0   :  { %v3795_v4 = vpop.permute.xlu1 %3794  ;;  %v3662_v36 = vpack.c.bf16 %v2059_v33, %v2058_v44 }
 0xcf1   :  { %v3797_v10 = vunpack.i.h.bf16 %v3795_v4  ;;  %v3796_v11 = vunpack.i.l.bf16 %v3795_v4  ;;  %3560 = vmatprep.subr.msk.bf16.mxu0 %vm4351_vm1, %v3558_v40  ;;  %v4970_v4 = vld [vmem:[#allocation19_spill] sm:$0xff] }
 0xcf3   :  { %v3564_v17 = vpack.c.bf16 %v3797_v10, %v3796_v11  ;;  %v1613_v10 = vmul.f32 %v4639_v32, %v4970_v4  ;;  %v4971_v11 = vld [vmem:[#allocation23_spill] sm:$0xff] }
 0xcf4   :  { %v3805_v29 = vpop.permute.xlu1 %3804 }
 0xcf5   :  { %v3807_v31 = vunpack.i.h.bf16 %v3805_v29  ;;  %v3806_v7 = vunpack.i.l.bf16 %v3805_v29 }
 0xcf6   :  { %3563 = vmatpush3.bf16.xpose.msk.msra.mxu0 %vm4351_vm1, %v3558_v40 }
 0xcf7   :  { %3566 = vmatprep.subr.msk.bf16.mxu0 %vm4351_vm1, %v3564_v17  ;;  %v3576_v27 = vpack.c.bf16 %v3807_v31, %v3806_v7 }
 0xcf8   :  { %v3815_v59 = vpop.permute.xlu1 %3814 }
 0xcf9   :  { %v3817_v63 = vunpack.i.h.bf16 %v3815_v59  ;;  %v3816_v54 = vunpack.i.l.bf16 %v3815_v59 }
 0xcfb   :  { %v3588_v48 = vpack.c.bf16 %v3817_v63, %v3816_v54 }
 0xcfe   :  { %3569 = vmatpush3.bf16.xpose.msk.msra.mxu0 %vm4351_vm1, %v3564_v17 }
 0xcff   :  { %3572 = vmatprep.subr.msk.bf16.mxu0 %vm4351_vm1, %v3570_v26 }
 0xd06   :  { %3575 = vmatpush3.bf16.xpose.msk.msra.mxu0 %vm4351_vm1, %v3570_v26 }
 0xd07   :  { %3578 = vmatprep.subr.msk.bf16.mxu0 %vm4351_vm1, %v3576_v27 }
 0xd0e   :  { %3581 = vmatpush3.bf16.xpose.msk.msra.mxu0 %vm4351_vm1, %v3576_v27 }
 0xd0f   :  { %3584 = vmatprep.subr.msk.bf16.mxu0 %vm4351_vm1, %v3582_v56 }
 0xd16   :  { %3587 = vmatpush3.bf16.xpose.msk.msra.mxu0 %vm4351_vm1, %v3582_v56 }
 0xd17   :  { %3590 = vmatprep.subr.msk.bf16.mxu0 %vm4351_vm1, %v3588_v48 }
 0xd1e   :  { %3593 = vmatpush3.bf16.xpose.msk.msra.mxu0 %vm4351_vm1, %v3588_v48 }
 0xd25   :  { %3223 = vmatmul.mubr.msk.f32.vlgmr.msra.gmra.mrb[12].mxu0 %vm173_vm0, %v4637_v14 }
 0xd26   :  { %3225 = vmatprep.mubr.msk.f32.mxu0 %vm173_vm0, %v4659_v19  ;;  %v1614_v19 = vmul.f32 %v4637_v14, %v4971_v11 }
 0xd28   :  { %v3848_v17 = vpack.i.bf16 %v1614_v19, %v1613_v10 }
 0xd29   :  { %3226 = vmatmul.mubr.msk.f32.gmra.mrb[14].mxu0 %vm173_vm0, %v4657_v60  ;;  %v3825_v60 = vpop.permute.xlu1 %3824 }
 0xd2a   :  { %v3827_v57 = vunpack.i.h.bf16 %v3825_v60  ;;  %v3826_v3 = vunpack.i.l.bf16 %v3825_v60 }
 0xd2c   :  { %v3630_v59 = vpack.c.bf16 %v3827_v57, %v3826_v3 }
 0xdf8   :  { %v3224_v47 = vpop.f32.mrb[12].mxu0 }
 0xdf9   :  { %v1781_v49 = vadd.f32 %v3946_v16, %v3224_v47  ;;  %v1775_v22 = vpop.f32.mrb[13].mxu0 }
 0xdfa   :  { %v1776_v51 = vadd.f32 %v3947_v39, %v1775_v22 }
 0xdfb   :  { %1796 = vmax.xlane.f32.xlu1 %v1781_v49 }
 0xdfc   :  { %v3227_v58 = vpop.f32.mrb[14].mxu0  ;;  %1794 = vmax.xlane.f32.xlu0 %v1776_v51 }
 0xdfd   :  { %v1785_v1 = vpop.f32.mrb[15].mxu0  ;;  %v1791_v38 = vadd.f32 %v3948_v55, %v3227_v58 }
 0xdfe   :  { %v1786_v40 = vadd.f32 %v3949_v50, %v1785_v1 }
 0xe0c   :  { %3829 = vrot.lane.b32.xlu1 %v3828_v2, %s4028_s7 }
 0xe10   :  { %3834 = vrot.lane.b32.xlu1 %v3833_v41, %s4028_s7 }
 0xe12   :  { %3839 = vrot.lane.b32.xlu0 %v3838_v18, %s4028_s7  ;;  %v2056_v18 = vld [vmem:[#allocation5 + $0x228] sm:$0xff] }
 0xe14   :  { %3844 = vrot.lane.b32.xlu1 %v3843_v45, %s4028_s7  ;;  %v2057_v45 = vld [vmem:[#allocation5 + $0x230] sm:$0xff] }
 0xe15   :  { %v3658_v43 = vpack.c.bf16 %v2057_v45, %v2056_v18 }
 0xe17   :  { %3659 = vmatprep.subr.bf16.mxu0 %v3658_v43 }
 0xe18   :  { %3854 = vrot.lane.b32.xlu1 %v3853_v24, %s4028_s7  ;;  %3661 = vmatpush3.bf16.msra.mxu0 %v3658_v43 }
 0xe19   :  { %3663 = vmatprep.subr.bf16.mxu0 %v3662_v36 }
 0xe1c   :  { %3665 = vmatpush3.bf16.msra.mxu0 %v3662_v36 }
 0xe31   :  { %1800 = vmax.xlane.f32.xlu0 %v1791_v38 }
 0xe35   :  { %1798 = vmax.xlane.f32.xlu0 %v1786_v40 }
 0xe4b   :  { %3849 = vrot.lane.b32.xlu0 %v3848_v17, %s4028_s7 }
 0xe88   :  { %v1797_v20 = vpop.xlane.xlu1 %1796 }
 0xe89   :  { %v1803_v23 = vsub.f32 %v1781_v49, %v1797_v20  ;;  %v1795_v26 = vpop.xlane.xlu0 %1794 }
 0xe8a   :  { %v1802_v29 = vsub.f32 %v1776_v51, %v1795_v26 }
 0xe8b   :  { %v1808_v31 = vmul.f32 1.442695, %v1803_v23 }
 0xe8c   :  { %v1806_v7 = vmul.f32 1.442695, %v1802_v29  ;;  %v3830_v27 = vpop.permute.xlu1 %3829 }
 0xe8d   :  { %v3832_v14 = vunpack.i.h.bf16 %v3830_v27  ;;  %v3831_v63 = vunpack.i.l.bf16 %v3830_v27  ;;  %v3840_v49 = vpop.permute.xlu0 %3839  ;;  %v2731_v27 = vld [vmem:[#allocation5 + $0x248] ss:$0 sm:$0xff] }
 0xe8e   :  { %3906 = vpow2.f32 %v1806_v7  ;;  %v3842_v22 = vunpack.i.h.bf16 %v3840_v49  ;;  %v3841_v39 = vunpack.i.l.bf16 %v3840_v49 }
 0xe8f   :  { %3908 = vpow2.f32 %v1808_v31  ;;  %v3634_v48 = vpack.c.bf16 %v3832_v14, %v3831_v63 }
 0xe90   :  { %v3835_v54 = vpop.permute.xlu1 %3834  ;;  %v3642_v1 = vpack.c.bf16 %v3842_v22, %v3841_v39 }
 0xe91   :  { %v3837_v47 = vunpack.i.h.bf16 %v3835_v54  ;;  %v3836_v16 = vunpack.i.l.bf16 %v3835_v54 }
 0xe93   :  { %v3638_v51 = vpack.c.bf16 %v3837_v47, %v3836_v16 }
 0xe94   :  { %v3845_v58 = vpop.permute.xlu1 %3844 }
 0xe95   :  { %v3847_v46 = vunpack.i.h.bf16 %v3845_v58  ;;  %v3846_v52 = vunpack.i.l.bf16 %v3845_v58 }
 0xe97   :  { %v3646_v53 = vpack.c.bf16 %v3847_v46, %v3846_v52 }
 0xe98   :  { %v3907_v56 = vpop.eup %3906  ;;  %v3855_v62 = vpop.permute.xlu1 %3854 }
 0xe99   :  { %v3909_v32 = vpop.eup %3908  ;;  %3260 = vmatprep.mubr.f32.mxu1 %v3907_v56  ;;  %v3857_v30 = vunpack.i.h.bf16 %v3855_v62  ;;  %v3856_v42 = vunpack.i.l.bf16 %v3855_v62 }
 0xe9a   :  { %3261 = vmatmul.mubr.f32.vlgmr.msra.gmra.mrb[24].mxu1 %v3909_v32 }
 0xe9b   :  { %3629 = vmatpush3.bf16.msra.mxu1 %v4701_v35  ;;  %v3654_v28 = vpack.c.bf16 %v3857_v30, %v3856_v42 }
 0xe9c   :  { %3631 = vmatprep.subr.bf16.mxu1 %v3630_v59 }
 0xe9f   :  { %3633 = vmatpush3.bf16.msra.mxu1 %v3630_v59 }
 0xea0   :  { %3635 = vmatprep.subr.bf16.mxu1 %v3634_v48 }
 0xea3   :  { %3637 = vmatpush3.bf16.msra.mxu1 %v3634_v48 }
 0xea4   :  { %3639 = vmatprep.subr.bf16.mxu1 %v3638_v51 }
 0xea7   :  { %3641 = vmatpush3.bf16.msra.mxu1 %v3638_v51 }
 0xea8   :  { %3643 = vmatprep.subr.bf16.mxu1 %v3642_v1 }
 0xeab   :  { %3645 = vmatpush3.bf16.msra.mxu1 %v3642_v1 }
 0xeac   :  { %3647 = vmatprep.subr.bf16.mxu1 %v3646_v53 }
 0xeaf   :  { %3649 = vmatpush3.bf16.msra.mxu1 %v3646_v53 }
 0xebe   :  { %v1801_v35 = vpop.xlane.xlu0 %1800 }
 0xebf   :  { %v1805_v15 = vsub.f32 %v1791_v38, %v1801_v35 }
 0xec1   :  { %v1812_v25 = vmul.f32 1.442695, %v1805_v15 }
 0xec2   :  { %v1799_v2 = vpop.xlane.xlu0 %1798 }
 0xec3   :  { %v1804_v61 = vsub.f32 %v1786_v40, %v1799_v2 }
 0xec5   :  { %v1810_v34 = vmul.f32 1.442695, %v1804_v61 }
 0xec6   :  { %v3850_v5 = vpop.permute.xlu0 %3849 }
 0xec7   :  { %3910 = vpow2.f32 %v1810_v34  ;;  %v3852_v6 = vunpack.i.h.bf16 %v3850_v5  ;;  %v3851_v41 = vunpack.i.l.bf16 %v3850_v5 }
 0xec8   :  { %3912 = vpow2.f32 %v1812_v25 }
 0xec9   :  { %v3650_v9 = vpack.c.bf16 %v3852_v6, %v3851_v41  ;;  %v2222_v41 = vld [vmem:[#allocation5 + $0x250] sm:$0xff] }
 0xecb   :  { %3651 = vmatprep.subr.bf16.mxu1 %v3650_v9 }
 0xecc   :  { %3653 = vmatpush3.bf16.msra.mxu1 %v3650_v9  ;;  %v2223_v9 = vld [vmem:[#allocation5 + $0x258] sm:$0xff] }
 0xecd   :  { %3655 = vmatprep.subr.bf16.mxu1 %v3654_v28 }
 0xed0   :  { %3657 = vmatpush3.bf16.msra.mxu1 %v3654_v28  ;;  %v3666_v28 = vpack.c.bf16 %v2223_v9, %v2222_v41 }
 0xed1   :  { %v3911_v37 = vpop.eup %3910 }
 0xed2   :  { %v3913_v0 = vpop.eup %3912  ;;  %3263 = vmatprep.mubr.f32.mxu1 %v3911_v37  ;;  %3667 = vmatprep.subr.bf16.mxu1 %v3666_v28 }
 0xed3   :  { %3264 = vmatmul.mubr.f32.gmra.mrb[26].mxu1 %v3913_v0 }
 0xed4   :  { %3298 = vmatprep.mubr.f32.mxu1 %v3907_v56 }
 0xed7   :  { %3299 = vmatmul.mubr.f32.vlgmr.msra.gmra.mrb[28].mxu1 %v3909_v32 }
 0xed8   :  { %3301 = vmatprep.mubr.f32.mxu1 %v3911_v37  ;;  %v2224_v37 = vld [vmem:[#allocation5 + $0x260] sm:$0xff]  ;;  %3669 = vmatpush3.bf16.msra.mxu1 %v3666_v28 }
 0xedb   :  { %3302 = vmatmul.mubr.f32.gmra.mrb[30].mxu1 %v3913_v0  ;;  %v2225_v0 = vld [vmem:[#allocation5 + $0x268] sm:$0xff] }
 0xedc   :  { %v3670_v18 = vpack.c.bf16 %v2225_v0, %v2224_v37 }
 0xede   :  { %3671 = vmatprep.subr.bf16.mxu1 %v3670_v18 }
 0xedf   :  { %3673 = vmatpush3.bf16.msra.mxu1 %v3670_v18 }
 0xf6d   :  { %v3262_v24 = vpop.f32.mrb[24].mxu1 }
 0xf6e   :  { %v1880_v55 = vpop.f32.mrb[25].mxu1  ;;  %3914 = vrcp.f32 %v3262_v24 }
 0xf6f   :  { %3916 = vrcp.f32 %v1880_v55 }
 0xf78   :  { %v3915_v40 = vpop.eup %3914 }
 0xf79   :  { %v3917_v10 = vpop.eup %3916 }
 0xfa6   :  { %v3265_v38 = vpop.f32.mrb[26].mxu1 }
 0xfa7   :  { %3918 = vrcp.f32 %v3265_v38  ;;  %v1890_v50 = vpop.f32.mrb[27].mxu1 }
 0xfa8   :  { %3920 = vrcp.f32 %v1890_v50 }
 0xfaa   :  { %v3300_v4 = vpop.f32.mrb[28].mxu1 }
 0xfab   :  { %v2053_v11 = vmul.f32 %v3915_v40, %v3300_v4  ;;  %v2029_v19 = vpop.f32.mrb[29].mxu1 }
 0xfac   :  { %v2052_v17 = vmul.f32 %v3917_v10, %v2029_v19 }
 0xfae   :  { %v3303_v60 = vpop.f32.mrb[30].mxu1  ;;  %3312 = vmatprep.mubr.msk.f32.mxu0 %vm173_vm0, %v2052_v17 }
 0xfaf   :  { %v2039_v20 = vpop.f32.mrb[31].mxu1  ;;  %3313 = vmatmul.mubr.msk.f32.vlgmr.msra.gmra.mrb[16].mxu0 %vm173_vm0, %v2053_v11 }
 0xfb1   :  { %v3919_v23 = vpop.eup %3918 }
 0xfb2   :  { %v3921_v26 = vpop.eup %3920  ;;  %v2055_v29 = vmul.f32 %v3919_v23, %v3303_v60 }
 0xfb3   :  { %v2054_v31 = vmul.f32 %v3921_v26, %v2039_v20 }
 0xfb5   :  { %3315 = vmatprep.mubr.msk.f32.mxu0 %vm173_vm0, %v2054_v31  ;;  %v2448_v31 = vld [vmem:[#allocation5 + $0x278] sm:$0xff] }
 0xfb6   :  { %3316 = vmatmul.mubr.msk.f32.gmra.mrb[18].mxu0 %vm173_vm0, %v2055_v29 }
0x1082   :  { %v3314_v7 = vpop.f32.mrb[16].mxu0 }
0x1083   :  { %v2158_v57 = vadd.f32 %v3314_v7, %v4591_v8  ;;  %v2138_v3 = vpop.f32.mrb[17].mxu0  ;;  %v2449_v7 = vld [vmem:[#allocation5 + $0x280] sm:$0xff] }
0x1084   :  { %v2157_v56 = vadd.f32 %v2138_v3, %v4593_v13  ;;  %v2451_v3 = vld [vmem:[#allocation5 + $0x290] sm:$0xff] }
0x1085   :  { %v4775_v32 = vadd.f32 %v2731_v27, %v2158_v57  ;;  %v2450_v57 = vld [vmem:[#allocation5 + $0x288] sm:$0xff] }
0x1086   :  { %v4777_v59 = vadd.f32 %v2731_v27, %v2157_v56  ;;  %v3678_v56 = vpack.c.bf16 %v2451_v3, %v2450_v57 }
0x1087   :  { %v2173_v14 = vsel %vm173_vm0, %v4775_v32, 0.0 }
0x1088   :  { %2174 = vadd.xlane.f32.xlu1 %v2173_v14  ;;  %v2170_v63 = vsel %vm173_vm0, %v4777_v59, 0.0  ;;  %v2452_v14 = vld [vmem:[#allocation5 + $0x298] sm:$0xff] }
0x1089   :  { %2171 = vadd.xlane.f32.xlu0 %v2170_v63  ;;  %v3317_v54 = vpop.f32.mrb[18].mxu0  ;;  %v2453_v63 = vld [vmem:[#allocation5 + $0x2a0] sm:$0xff] }
0x108a   :  { %v2148_v48 = vpop.f32.mrb[19].mxu0  ;;  %v2160_v47 = vadd.f32 %v3317_v54, %v4601_v21  ;;  %v3682_v54 = vpack.c.bf16 %v2453_v63, %v2452_v14 }
0x108b   :  { %v2159_v8 = vadd.f32 %v2148_v48, %v4603_v12  ;;  %v2454_v48 = vld [vmem:[#allocation5 + $0x2a8] sm:$0xff] }
0x108c   :  { %v4787_v13 = vadd.f32 %v2731_v27, %v2160_v47  ;;  %v2455_v47 = vld [vmem:[#allocation5 + $0x2b0] sm:$0xff] }
0x108d   :  { %v4785_v16 = vadd.f32 %v2731_v27, %v2159_v8  ;;  %v3674_v27 = vpack.c.bf16 %v2449_v7, %v2448_v31  ;;  %v3686_v8 = vpack.c.bf16 %v2455_v47, %v2454_v48 }
0x108e   :  { %v2179_v22 = vsel %vm173_vm0, %v4787_v13, 0.0 }
0x108f   :  { %v2176_v49 = vsel %vm173_vm0, %v4785_v16, 0.0  ;;  %3675 = vmatprep.subr.bf16.mxu0 %v3674_v27 }
0x1090   :  { %2177 = vadd.xlane.f32.xlu0 %v2176_v49  ;;  %3677 = vmatpush3.bf16.msra.mxu0 %v3674_v27  ;;  %v2732_v49 = vld [vmem:[#allocation5 + $0x270] ss:$0 sm:$0xff] }
0x1091   :  { %3679 = vmatprep.subr.bf16.mxu0 %v3678_v56 }
0x1094   :  { %2180 = vadd.xlane.f32.xlu0 %v2179_v22  ;;  %3681 = vmatpush3.bf16.msra.mxu0 %v3678_v56 }
0x1095   :  { %3683 = vmatprep.subr.bf16.mxu0 %v3682_v54 }
0x1098   :  { %3685 = vmatpush3.bf16.msra.mxu0 %v3682_v54 }
0x1099   :  { %3687 = vmatprep.subr.bf16.mxu0 %v3686_v8 }
0x109c   :  { %3689 = vmatpush3.bf16.msra.mxu0 %v3686_v8 }
0x1115   :  { %v2175_v39 = vpop.xlane.xlu1 %2174 }
0x1116   :  { %v2183_v51 = vmul.f32 0.03125, %v2175_v39  ;;  %v2172_v58 = vpop.xlane.xlu0 %2171 }
0x1117   :  { %v2182_v1 = vmul.f32 0.03125, %v2172_v58 }
0x1118   :  { %v2187_v21 = vsub.f32 %v4775_v32, %v2183_v51 }
0x1119   :  { %v2186_v12 = vsub.f32 %v4777_v59, %v2182_v1 }
0x111a   :  { %v2191_v46 = vmul.f32 %v2187_v21, %v2187_v21 }
0x111b   :  { %v2190_v52 = vmul.f32 %v2186_v12, %v2186_v12 }
0x111c   :  { %v2197_v53 = vsel %vm173_vm0, %v2191_v46, 0.0 }
0x111d   :  { %2198 = vadd.xlane.f32.xlu1 %v2197_v53  ;;  %v2178_v35 = vpop.xlane.xlu0 %2177  ;;  %v2194_v15 = vsel %vm173_vm0, %v2190_v52, 0.0 }
0x111e   :  { %v2184_v2 = vmul.f32 0.03125, %v2178_v35  ;;  %2195 = vadd.xlane.f32.xlu0 %v2194_v15 }
0x1120   :  { %v2188_v62 = vsub.f32 %v4785_v16, %v2184_v2 }
0x1121   :  { %v2181_v61 = vpop.xlane.xlu0 %2180 }
0x1122   :  { %v2185_v25 = vmul.f32 0.03125, %v2181_v61  ;;  %v2192_v34 = vmul.f32 %v2188_v62, %v2188_v62 }
0x1124   :  { %v2189_v30 = vsub.f32 %v4787_v13, %v2185_v25  ;;  %v2200_v5 = vsel %vm173_vm0, %v2192_v34, 0.0 }
0x1125   :  { %2201 = vadd.xlane.f32.xlu0 %v2200_v5 }
0x1126   :  { %v2193_v42 = vmul.f32 %v2189_v30, %v2189_v30 }
0x1128   :  { %v2203_v6 = vsel %vm173_vm0, %v2193_v42, 0.0 }
0x1129   :  { %2204 = vadd.xlane.f32.xlu1 %v2203_v6 }
0x11aa   :  { %v2199_v45 = vpop.xlane.xlu1 %2198 }
0x11ab   :  { %v2207_v43 = vmul.f32 0.03125, %v2199_v45  ;;  %v2196_v44 = vpop.xlane.xlu0 %2195 }
0x11ac   :  { %v2206_v33 = vmul.f32 0.03125, %v2196_v44 }
0x11ad   :  { %v2211_v36 = vadd.f32 1e-06, %v2207_v43 }
0x11ae   :  { %v2210_v24 = vadd.f32 1e-06, %v2206_v33 }
0x11af   :  { %3922 = vrsqrt.f32 %v2211_v36 }
0x11b0   :  { %3924 = vrsqrt.f32 %v2210_v24 }
0x11b2   :  { %v2202_v55 = vpop.xlane.xlu0 %2201 }
0x11b3   :  { %v2208_v38 = vmul.f32 0.03125, %v2202_v55 }
0x11b5   :  { %v2212_v50 = vadd.f32 1e-06, %v2208_v38 }
0x11b6   :  { %v2205_v40 = vpop.xlane.xlu1 %2204 }
0x11b7   :  { %3926 = vrsqrt.f32 %v2212_v50  ;;  %v2209_v4 = vmul.f32 0.03125, %v2205_v40 }
0x11b9   :  { %v3923_v10 = vpop.eup %3922  ;;  %v2213_v11 = vadd.f32 1e-06, %v2209_v4 }
0x11ba   :  { %v3925_v19 = vpop.eup %3924  ;;  %v2219_v60 = vmul.f32 %v3923_v10, %v2187_v21 }
0x11bb   :  { %3928 = vrsqrt.f32 %v2213_v11  ;;  %v2218_v17 = vmul.f32 %v3925_v19, %v2186_v12 }
0x11bd   :  { %3326 = vmatprep.mubr.msk.f32.mxu1 %vm173_vm0, %v2218_v17 }
0x11be   :  { %3327 = vmatmul.mubr.msk.f32.vlgmr.msra.gmra.mrb[32].mxu1 %vm173_vm0, %v2219_v60 }
0x11c1   :  { %v3927_v20 = vpop.eup %3926 }
0x11c2   :  { %v2220_v23 = vmul.f32 %v3927_v20, %v2188_v62 }
0x11c4   :  { %3329 = vmatprep.mubr.msk.f32.mxu1 %vm173_vm0, %v2220_v23 }
0x11c5   :  { %v3929_v26 = vpop.eup %3928 }
0x11c6   :  { %v2221_v29 = vmul.f32 %v3929_v26, %v2189_v30 }
0x11c8   :  { %3330 = vmatmul.mubr.msk.f32.gmra.mrb[34].mxu1 %vm173_vm0, %v2221_v29 }
0x1291   :  { %v3328_v22 = vpop.f32.mrb[32].mxu1 }
0x1292   :  { %v4805_v39 = vadd.f32 %v3328_v22, %v2732_v49  ;;  %v2309_v51 = vpop.f32.mrb[33].mxu1 }
0x1293   :  { %v4807_v58 = vadd.f32 %v2732_v49, %v2309_v51 }
0x1294   :  { %v2333_v1 = vmul.f32 0.70710677, %v4805_v39 }
0x1295   :  { %v2332_v21 = vmul.f32 0.70710677, %v4807_v58 }
0x1296   :  { %v4811_v12 = vclamps-f32 %v2333_v1, 4.0 }
0x1297   :  { %v4813_v46 = vclamps-f32 %v2332_v21, 4.0 }
0x1298   :  { %v4817_v52 = vmul.f32 %v4811_v12, %v4811_v12 }
0x1299   :  { %v4821_v53 = vmul.f32 %v4813_v46, %v4813_v46 }
0x129a   :  { %v2349_v35 = vmul.f32 -2.7261424e-10, %v4817_v52  ;;  %v2397_v15 = vmul.f32 -1.45660715e-05, %v4817_v52 }
0x129b   :  { %v2348_v2 = vmul.f32 -2.7261424e-10, %v4821_v53  ;;  %v2396_v62 = vmul.f32 -1.45660715e-05, %v4821_v53  ;;  %v3331_v61 = vpop.f32.mrb[34].mxu1 }
0x129c   :  { %v2353_v25 = vadd.f32 2.7706815e-08, %v2349_v35  ;;  %v2401_v34 = vadd.f32 -0.00021337405, %v2397_v15  ;;  %v4827_v30 = vadd.f32 %v3331_v61, %v2732_v49  ;;  %v2319_v5 = vpop.f32.mrb[35].mxu1 }
0x129d   :  { %v2352_v42 = vadd.f32 2.7706815e-08, %v2348_v2  ;;  %v2400_v6 = vadd.f32 -0.00021337405, %v2396_v62  ;;  %v4829_v41 = vadd.f32 %v2732_v49, %v2319_v5 }
0x129e   :  { %v2357_v9 = vmul.f32 %v2353_v25, %v4817_v52  ;;  %v2405_v28 = vmul.f32 %v2401_v34, %v4817_v52  ;;  %v2335_v37 = vmul.f32 0.70710677, %v4827_v30 }
0x129f   :  { %v2356_v0 = vmul.f32 %v2352_v42, %v4821_v53  ;;  %v2404_v18 = vmul.f32 %v2400_v6, %v4821_v53  ;;  %v2334_v45 = vmul.f32 0.70710677, %v4829_v41 }
0x12a0   :  { %v2361_v43 = vadd.f32 -2.101024e-06, %v2357_v9  ;;  %v2409_v44 = vadd.f32 -0.001682827, %v2405_v28  ;;  %v4837_v33 = vclamps-f32 %v2335_v37, 4.0 }
0x12a1   :  { %v2360_v36 = vadd.f32 -2.101024e-06, %v2356_v0  ;;  %v2408_v24 = vadd.f32 -0.001682827, %v2404_v18  ;;  %v4839_v55 = vclamps-f32 %v2334_v45, 4.0 }
0x12a2   :  { %v2365_v38 = vmul.f32 %v2361_v43, %v4817_v52  ;;  %v2413_v50 = vmul.f32 %v2409_v44, %v4817_v52  ;;  %v4845_v40 = vmul.f32 %v4837_v33, %v4837_v33 }
0x12a3   :  { %v2364_v4 = vmul.f32 %v2360_v36, %v4821_v53  ;;  %v2412_v10 = vmul.f32 %v2408_v24, %v4821_v53  ;;  %v4851_v11 = vmul.f32 %v4839_v55, %v4839_v55 }
0x12a4   :  { %v2369_v19 = vadd.f32 -5.6925062e-05, %v2365_v38  ;;  %v2417_v17 = vadd.f32 -0.0073733293, %v2413_v50  ;;  %v2351_v60 = vmul.f32 -2.7261424e-10, %v4845_v40 }
0x12a5   :  { %v2368_v20 = vadd.f32 -5.6925062e-05, %v2364_v4  ;;  %v2416_v23 = vadd.f32 -0.0073733293, %v2412_v10  ;;  %v2399_v26 = vmul.f32 -1.45660715e-05, %v4845_v40 }
0x12a6   :  { %v2373_v29 = vmul.f32 %v2369_v19, %v4817_v52  ;;  %v2421_v31 = vmul.f32 %v2417_v17, %v4817_v52  ;;  %v2355_v7 = vadd.f32 2.7706815e-08, %v2351_v60  ;;  %v2350_v27 = vmul.f32 -2.7261424e-10, %v4851_v11 }
0x12a7   :  { %v2372_v57 = vmul.f32 %v2368_v20, %v4821_v53  ;;  %v2420_v3 = vmul.f32 %v2416_v23, %v4821_v53  ;;  %v2403_v56 = vadd.f32 -0.00021337405, %v2399_v26  ;;  %v2398_v14 = vmul.f32 -1.45660715e-05, %v4851_v11 }
0x12a8   :  { %v2377_v63 = vadd.f32 -0.00073499064, %v2373_v29  ;;  %v2425_v54 = vadd.f32 -0.014264739, %v2421_v31  ;;  %v2359_v48 = vmul.f32 %v2355_v7, %v4845_v40  ;;  %v2354_v47 = vadd.f32 2.7706815e-08, %v2350_v27 }
0x12a9   :  { %v2376_v8 = vadd.f32 -0.00073499064, %v2372_v57  ;;  %v2424_v49 = vadd.f32 -0.014264739, %v2420_v3  ;;  %v2407_v22 = vmul.f32 %v2403_v56, %v4845_v40  ;;  %v2402_v51 = vadd.f32 -0.00021337405, %v2398_v14 }
0x12aa   :  { %v2381_v1 = vmul.f32 %v2377_v63, %v4817_v52  ;;  %3930 = vrcp.f32 %v2425_v54  ;;  %v2363_v21 = vadd.f32 -2.101024e-06, %v2359_v48  ;;  %v2358_v35 = vmul.f32 %v2354_v47, %v4851_v11 }
0x12ab   :  { %v2380_v15 = vmul.f32 %v2376_v8, %v4821_v53  ;;  %3932 = vrcp.f32 %v2424_v49  ;;  %v2411_v2 = vadd.f32 -0.001682827, %v2407_v22  ;;  %v2406_v62 = vmul.f32 %v2402_v51, %v4851_v11 }
0x12ac   :  { %v2385_v61 = vadd.f32 -0.0029546, %v2381_v1  ;;  %v2367_v25 = vmul.f32 %v2363_v21, %v4845_v40  ;;  %v2362_v34 = vadd.f32 -2.101024e-06, %v2358_v35  ;;  %v2328_v3 = vmul.f32 0.5, %v4807_v58 }
0x12ad   :  { %v2384_v5 = vadd.f32 -0.0029546, %v2380_v15  ;;  %v2415_v42 = vmul.f32 %v2411_v2, %v4845_v40  ;;  %v2410_v6 = vadd.f32 -0.001682827, %v2406_v62  ;;  %v2329_v63 = vmul.f32 0.5, %v4805_v39 }
0x12ae   :  { %v2389_v9 = vmul.f32 %v2385_v61, %v4817_v52  ;;  %v2371_v28 = vadd.f32 -5.6925062e-05, %v2367_v25  ;;  %v2366_v37 = vmul.f32 %v2362_v34, %v4851_v11  ;;  %v2330_v39 = vmul.f32 0.5, %v4829_v41  ;;  %v2745_v61 = vld [vmem:[#allocation5 + $0x2b8] ss:$0 sm:$0xff] }
0x12af   :  { %v2388_v0 = vmul.f32 %v2384_v5, %v4821_v53  ;;  %v2419_v18 = vadd.f32 -0.0073733293, %v2415_v42  ;;  %v2414_v45 = vmul.f32 %v2410_v6, %v4851_v11 }
0x12b0   :  { %v2393_v43 = vadd.f32 -0.016096033, %v2389_v9  ;;  %v2375_v44 = vmul.f32 %v2371_v28, %v4845_v40  ;;  %v2370_v36 = vadd.f32 -5.6925062e-05, %v2366_v37 }
0x12b1   :  { %v2392_v24 = vadd.f32 -0.016096033, %v2388_v0  ;;  %v2423_v38 = vmul.f32 %v2419_v18, %v4845_v40  ;;  %v2418_v50 = vadd.f32 -0.0073733293, %v2414_v45 }
0x12b2   :  { %v2429_v4 = vmul.f32 %v4811_v12, %v2393_v43  ;;  %v2379_v10 = vadd.f32 -0.00073499064, %v2375_v44  ;;  %v2374_v52 = vmul.f32 %v2370_v36, %v4851_v11 }
0x12b3   :  { %v2428_v19 = vmul.f32 %v4813_v46, %v2392_v24  ;;  %v2427_v17 = vadd.f32 -0.014264739, %v2423_v38  ;;  %v2422_v53 = vmul.f32 %v2418_v50, %v4851_v11 }
0x12b4   :  { %v3931_v60 = vpop.eup %3930  ;;  %v2383_v20 = vmul.f32 %v2379_v10, %v4845_v40  ;;  %v2378_v23 = vadd.f32 -0.00073499064, %v2374_v52 }
0x12b5   :  { %v3933_v26 = vpop.eup %3932  ;;  %v2437_v29 = vmul.f32 %v3931_v60, %v2429_v4  ;;  %3934 = vrcp.f32 %v2427_v17  ;;  %v2426_v31 = vadd.f32 -0.014264739, %v2422_v53 }
0x12b6   :  { %v2436_v7 = vmul.f32 %v3933_v26, %v2428_v19  ;;  %v2387_v27 = vadd.f32 -0.0029546, %v2383_v20  ;;  %v2382_v12 = vmul.f32 %v2378_v23, %v4851_v11 }
0x12b7   :  { %v2441_v57 = vadd.f32 1.0, %v2437_v29  ;;  %3936 = vrcp.f32 %v2426_v31 }
0x12b8   :  { %v2440_v46 = vadd.f32 1.0, %v2436_v7  ;;  %v2391_v56 = vmul.f32 %v2387_v27, %v4845_v40  ;;  %v2386_v14 = vadd.f32 -0.0029546, %v2382_v12 }
0x12b9   :  { %v2445_v8 = vmul.f32 %v2441_v57, %v2329_v63 }
0x12ba   :  { %v2444_v54 = vmul.f32 %v2440_v46, %v2328_v3  ;;  %v2395_v48 = vadd.f32 -0.016096033, %v2391_v56  ;;  %v2390_v47 = vmul.f32 %v2386_v14, %v4851_v11  ;;  %v2331_v11 = vmul.f32 0.5, %v4827_v30 }
0x12bc   :  { %v2431_v49 = vmul.f32 %v4837_v33, %v2395_v48  ;;  %v2394_v22 = vadd.f32 -0.016096033, %v2390_v47  ;;  %3348 = vmatprep.mubr.msk.f32.mxu0 %vm1316_vm2, %v2444_v54  ;;  %v2746_v48 = vld [vmem:[#allocation5 + $0x2c0] ss:$0 sm:$0xff] }
0x12bd   :  { %3349 = vmatmul.mubr.msk.f32.vlgmr.msra.gmra.mrb[20].mxu0 %vm1316_vm2, %v2445_v8 }
0x12be   :  { %v2430_v58 = vmul.f32 %v4839_v55, %v2394_v22 }
0x12bf   :  { %v3935_v51 = vpop.eup %3934 }
0x12c0   :  { %v2439_v1 = vmul.f32 %v3935_v51, %v2431_v49  ;;  %v2747_v51 = vld [vmem:[#allocation5 + $0x2c8] ss:$0 sm:$0xff] }
0x12c1   :  { %v3937_v40 = vpop.eup %3936 }
0x12c2   :  { %v2438_v21 = vmul.f32 %v3937_v40, %v2430_v58  ;;  %v2443_v35 = vadd.f32 1.0, %v2439_v1 }
0x12c4   :  { %v2442_v15 = vadd.f32 1.0, %v2438_v21  ;;  %v2447_v62 = vmul.f32 %v2443_v35, %v2331_v11 }
0x12c6   :  { %v2446_v2 = vmul.f32 %v2442_v15, %v2330_v39 }
0x12c8   :  { %3351 = vmatprep.mubr.msk.f32.mxu0 %vm1316_vm2, %v2446_v2 }
0x12c9   :  { %3352 = vmatmul.mubr.msk.f32.gmra.mrb[22].mxu0 %vm1316_vm2, %v2447_v62 }
0x1390   :  { %v3350_v33 = vpop.f32.mrb[20].mxu0 }
0x1391   :  { %v2554_v55 = vadd.f32 %v3350_v33, %v4775_v32  ;;  %v2534_v25 = vpop.f32.mrb[21].mxu0 }
0x1392   :  { %v2553_v34 = vadd.f32 %v2534_v25, %v4777_v59 }
0x1393   :  { %v2563_v5 = vadd.f32 %v2745_v61, %v2554_v55 }
0x1394   :  { %v2562_v42 = vadd.f32 %v2745_v61, %v2553_v34 }
0x1395   :  { %v2569_v41 = vsel %vm173_vm0, %v2563_v5, 0.0 }
0x1396   :  { %2570 = vadd.xlane.f32.xlu1 %v2569_v41  ;;  %v2566_v30 = vsel %vm173_vm0, %v2562_v42, 0.0 }
0x1397   :  { %2567 = vadd.xlane.f32.xlu0 %v2566_v30 }
0x139c   :  { %v3353_v6 = vpop.f32.mrb[22].mxu0 }
0x139d   :  { %v2556_v9 = vadd.f32 %v3353_v6, %v4787_v13  ;;  %v2544_v28 = vpop.f32.mrb[23].mxu0 }
0x139e   :  { %v2555_v37 = vadd.f32 %v2544_v28, %v4785_v16 }
0x139f   :  { %v2565_v0 = vadd.f32 %v2745_v61, %v2556_v9 }
0x13a0   :  { %v2564_v18 = vadd.f32 %v2745_v61, %v2555_v37 }
0x13a1   :  { %v2575_v32 = vsel %vm173_vm0, %v2565_v0, 0.0 }
0x13a2   :  { %2576 = vadd.xlane.f32.xlu1 %v2575_v32  ;;  %v2572_v59 = vsel %vm173_vm0, %v2564_v18, 0.0 }
0x13a3   :  { %2573 = vadd.xlane.f32.xlu0 %v2572_v59 }
0x1423   :  { %v2571_v45 = vpop.xlane.xlu1 %2570 }
0x1424   :  { %v2579_v43 = vmul.f32 0.03125, %v2571_v45  ;;  %v2568_v44 = vpop.xlane.xlu0 %2567 }
0x1425   :  { %v2578_v36 = vmul.f32 0.03125, %v2568_v44 }
0x1426   :  { %v2583_v24 = vsub.f32 %v2563_v5, %v2579_v43 }
0x1427   :  { %v2582_v38 = vsub.f32 %v2562_v42, %v2578_v36 }
0x1428   :  { %v2587_v50 = vmul.f32 %v2583_v24, %v2583_v24 }
0x1429   :  { %v2586_v4 = vmul.f32 %v2582_v38, %v2582_v38 }
0x142a   :  { %v2593_v13 = vsel %vm173_vm0, %v2587_v50, 0.0 }
0x142b   :  { %2594 = vadd.xlane.f32.xlu1 %v2593_v13  ;;  %v2590_v16 = vsel %vm173_vm0, %v2586_v4, 0.0 }
0x142c   :  { %2591 = vadd.xlane.f32.xlu0 %v2590_v16 }
0x142f   :  { %v2577_v10 = vpop.xlane.xlu1 %2576 }
0x1430   :  { %v2581_v52 = vmul.f32 0.03125, %v2577_v10  ;;  %v2574_v19 = vpop.xlane.xlu0 %2573 }
0x1431   :  { %v2580_v17 = vmul.f32 0.03125, %v2574_v19 }
0x1432   :  { %v2585_v53 = vsub.f32 %v2565_v0, %v2581_v52 }
0x1433   :  { %v2584_v60 = vsub.f32 %v2564_v18, %v2580_v17 }
0x1434   :  { %v2589_v20 = vmul.f32 %v2585_v53, %v2585_v53 }
0x1435   :  { %v2588_v23 = vmul.f32 %v2584_v60, %v2584_v60 }
0x1436   :  { %v2599_v26 = vsel %vm173_vm0, %v2589_v20, 0.0 }
0x1437   :  { %2600 = vadd.xlane.f32.xlu1 %v2599_v26  ;;  %v2596_v29 = vsel %vm173_vm0, %v2588_v23, 0.0 }
0x1438   :  { %2597 = vadd.xlane.f32.xlu0 %v2596_v29 }
0x14b8   :  { %v2595_v31 = vpop.xlane.xlu1 %2594 }
0x14b9   :  { %v2603_v7 = vmul.f32 0.03125, %v2595_v31  ;;  %v2592_v27 = vpop.xlane.xlu0 %2591 }
0x14ba   :  { %v2602_v12 = vmul.f32 0.03125, %v2592_v27 }
0x14bb   :  { %v2607_v57 = vadd.f32 1e-06, %v2603_v7 }
0x14bc   :  { %v2606_v3 = vadd.f32 1e-06, %v2602_v12 }
0x14bd   :  { %3938 = vrsqrt.f32 %v2607_v57 }
0x14be   :  { %3940 = vrsqrt.f32 %v2606_v3 }
0x14c4   :  { %v2601_v46 = vpop.xlane.xlu1 %2600 }
0x14c5   :  { %v2605_v56 = vmul.f32 0.03125, %v2601_v46  ;;  %v2598_v14 = vpop.xlane.xlu0 %2597 }
0x14c6   :  { %v2604_v63 = vmul.f32 0.03125, %v2598_v14 }
0x14c7   :  { %v3939_v54 = vpop.eup %3938  ;;  %v2609_v47 = vadd.f32 1e-06, %v2605_v56 }
0x14c8   :  { %v3941_v8 = vpop.eup %3940  ;;  %v2615_v49 = vmul.f32 %v3939_v54, %v2583_v24  ;;  %v2608_v22 = vadd.f32 1e-06, %v2604_v63 }
0x14c9   :  { %v2614_v58 = vmul.f32 %v3941_v8, %v2582_v38  ;;  %3942 = vrsqrt.f32 %v2609_v47 }
0x14ca   :  { %v2624_v1 = vmul.f32 %v2746_v48, %v2615_v49  ;;  %3944 = vrsqrt.f32 %v2608_v22 }
0x14cb   :  { %v2623_v40 = vmul.f32 %v2746_v48, %v2614_v58 }
0x14cc   :  { %v2633_v21 = vadd.f32 %v2747_v51, %v2624_v1 }
0x14cd   :  { %v2632_v35 = vadd.f32 %v2747_v51, %v2623_v40 }
0x14ce   :  { %2637 = vst.msk [vmem:[#allocation7 + $0x8] sm:$0xff] %vm173_vm0, %v2633_v21 }
0x14cf   :  { %2636 = vst.msk [vmem:[#allocation7] sm:$0xff] %vm173_vm0, %v2632_v35 }
0x14d3   :  { %v3943_v39 = vpop.eup %3942 }
0x14d4   :  { %v3945_v15 = vpop.eup %3944  ;;  %v2617_v11 = vmul.f32 %v3943_v39, %v2585_v53 }
0x14d5   :  { %v2616_v2 = vmul.f32 %v3945_v15, %v2584_v60 }
0x14d6   :  { %v2626_v62 = vmul.f32 %v2746_v48, %v2617_v11 }
0x14d7   :  { %v2625_v33 = vmul.f32 %v2746_v48, %v2616_v2 }
0x14d8   :  { %v2635_v61 = vadd.f32 %v2747_v51, %v2626_v62 }
0x14d9   :  { %v2634_v55 = vadd.f32 %v2747_v51, %v2625_v33 }
0x14da   :  { %2639 = vst.msk [vmem:[#allocation7 + $0x18] sm:$0xff] %vm173_vm0, %v2635_v61 }
0x14db   :  { %2638 = vst.msk [vmem:[#allocation7 + $0x10] sm:$0xff] %vm173_vm0, %v2634_v55 }
0x14dc   :  { %4005 = shalt.err (!%p4002_p6)
}
0x14dd   :  { %s4006_s13 = scalar_lea.hbm %s4926_s2, 512 }
0x14de   :  { %p4007_p7 = scmp.ne.s32.totalorder %s4926_s2, %s4006_s13  ;;  %p4010_p8 = scmp.lt.u32.totalorder %s4006_s13, %s4926_s2 }
0x14e0   :  { %p4012_p9 = pnand %p4010_p8, %p4007_p7 }
0x14e2   :  { %4015 = shalt.err (!%p4012_p9)
}
0x14e3   :  { %2651 = dma.vmem_to_hbm [thread:$0]  %s2646_s9, 512, %s4926_s2, [#allocation4], %s4023_s19, %s4023_s19, %s4024_s20  }
0x14e4   :  { %4020 = dma.done.wait [#allocation4], 512  }
0x14e5   :  { %4021 = vsyncadd [#allocation4], 4294966784 }
0x14e6   :  { %2655 = vsyncpa [#allocation3], 1 }
0x14e7   :  { %2656 = vsyncpa [#allocation6], 1 }
0x14e8   :  { %2657 = vsyncpa [#allocation4], 1 }

</bundles_post_ra>
